<compile_context>
chip_gen: v5e
topology: v5e:2x2
jax: 0.10.0
libtpu: 0.0.40
codegen_flags: <defaults>
</compile_context>

<pallas_src>
import functools

import jax
import jax.numpy as jnp
from jax.experimental import pallas as pl
from jax.experimental.pallas import tpu as pltpu


def _expand_kernel(x_ref, o_ref, *, s):
    # x_ref: (s*s, Cb, Hb, W)   sub-channel planes q = s1*s + s2 for a block of Cb channels
    # o_ref: (Cb, Hb, s*W*s)    free view of (Cb, Hb*s, W*s): lane index = s1*W*s + w*s + s2
    _, Cb, Hb, W = x_ref.shape
    Ws = W * s
    row_groups = []
    for s1 in range(s):
        planes = [x_ref[s1 * s + s2, :, :, :] for s2 in range(s)]      # each (Cb, Hb, W)
        # Column interleave over s2: (Cb, Hb, W, s) -> (Cb, Hb, W*s), col w*s+s2 <- plane s2.
        row_groups.append(jnp.stack(planes, axis=-1).reshape(Cb, Hb, Ws))
    # Row interleave over s1: output rows h*s+s1 live at lane offset s1*W*s of the
    # per-h flattened view, so this is just a concatenation along the lane dim.
    o_ref[...] = jnp.concatenate(row_groups, axis=-1)                  # (Cb, Hb, s*W*s)


def _round_up(v, m):
    return ((v + m - 1) // m) * m


def _step_bytes(cb, hb, W, s, itemsize):
    # Per-grid-step VMEM working set, including lane/sublane padding of small tiles
    # and ~1x extra for the in-kernel interleave temporaries.
    ph = _round_up(hb, 8)
    in_b = s * s * cb * ph * _round_up(W, 128) * itemsize
    out_b = cb * ph * _round_up(s * W * s, 128) * itemsize
    return in_b + 2 * out_b


def _pick_blocks(Cp, H, W, s, itemsize, budget=4 << 20):
    # Prefer the largest channel block that keeps full H (maximally contiguous HBM
    # segments); for huge per-channel planes fall back to 8-row-aligned H blocking.
    for cb in sorted((d for d in range(1, Cp + 1) if Cp % d == 0), reverse=True):
        if _step_bytes(cb, H, W, s, itemsize) <= budget:
            return cb, H
    hbs = [d for d in range(1, H + 1) if H % d == 0 and (d % 8 == 0 or d == H)]
    for hb in sorted(hbs, reverse=True):
        if _step_bytes(1, hb, W, s, itemsize) <= budget:
            return 1, hb
    # Nothing fits the soft budget: take the smallest legal H block; the 32 MiB
    # vmem limit still leaves headroom on all current chips.
    return 1, min(hbs)


def expand(x, gain=2):
    N, C, H, W = x.shape
    s = int(gain)
    assert s >= 1 and C % (s * s) == 0, "C must be divisible by gain**2"
    if s == 1:
        return x
    Cp = C // (s * s)
    itemsize = x.dtype.itemsize

    # Free view of NCHW memory: channel index = (s1*s + s2) * Cp + c'.
    xr = x.reshape(N, s * s, Cp, H, W)

    Cb, Hb = _pick_blocks(Cp, H, W, s, itemsize)
    grid = (N, Cp // Cb, H // Hb)

    out_flat = pl.pallas_call(
        functools.partial(_expand_kernel, s=s),
        out_shape=jax.ShapeDtypeStruct((N, Cp, H, s * W * s), x.dtype),
        grid=grid,
        in_specs=[
            pl.BlockSpec((None, s * s, Cb, Hb, W), lambda n, c, h: (n, 0, c, h, 0)),
        ],
        out_specs=pl.BlockSpec((None, Cb, Hb, s * W * s), lambda n, c, h: (n, c, h, 0)),
        compiler_params=pltpu.CompilerParams(
            dimension_semantics=("parallel", "parallel", "parallel"),
            vmem_limit_bytes=32 * 1024 * 1024,
        ),
        cost_estimate=pl.CostEstimate(
            flops=0,
            transcendentals=0,
            bytes_accessed=2 * N * C * H * W * itemsize,
        ),
    )(xr)

    # Free view back to the NCHW pixel-shuffled layout.
    return out_flat.reshape(N, Cp, H * s, W * s)


def expand_ref(x, gain=2):
    # Pure-JAX reference mirroring the PyTorch code exactly.
    N, C, H, W = x.shape
    s = gain
    Cp = C // (s * s)
    y = x.reshape(N, s, s, Cp, H, W)
    y = jnp.transpose(y, (0, 3, 4, 1, 5, 2))
    return y.reshape(N, Cp, H * s, W * s)


if __name__ == "__main__":
    key = jax.random.PRNGKey(0)

    # Primary small-shape check (matches the module's typical usage, gain=2).
    N, C, H, W = 2, 4, 16, 16
    gain = 2
    x = jax.random.normal(key, (N, C, H, W), dtype=jnp.float32)

    out = expand(x, gain=gain)
    out = jax.block_until_ready(out)
    ref = expand_ref(x, gain=gain)
    assert out.shape == (N, C // gain**2, H * gain, W * gain), out.shape
    assert out.dtype == x.dtype
    assert jnp.array_equal(out, ref), "Pallas output mismatch vs reference (gain=2)"

    # Extra coverage: multi-channel block (Cb > 1) and gain=4 paths.
    k1, k2 = jax.random.split(key)
    x2 = jax.random.normal(k1, (1, 8, 8, 32), dtype=jnp.float32)
    assert jnp.array_equal(jax.block_until_ready(expand(x2, gain=2)),
                           expand_ref(x2, gain=2)), "mismatch (Cb>1 case)"
    x3 = jax.random.normal(k2, (1, 16, 8, 8), dtype=jnp.float32)
    assert jnp.array_equal(jax.block_until_ready(expand(x3, gain=4)),
                           expand_ref(x3, gain=4)), "mismatch (gain=4 case)"

    print("KERNEL_OK")
</pallas_src>

<mosaic_0001>
module attributes {stable_mosaic.version = 11 : i64} {
  func.func @_expand_kernel(%arg0: i32, %arg1: i32, %arg2: i32, %arg3: memref<1x4x1x16x16xf32, #tpu.memory_space<vmem>>, %arg4: memref<1x1x16x64xf32, #tpu.memory_space<vmem>>) attributes {dimension_semantics = [#tpu.dimension_semantics<parallel>, #tpu.dimension_semantics<parallel>, #tpu.dimension_semantics<parallel>], iteration_bounds = array<i64: 2, 1, 1>, scalar_prefetch = 0 : i64, scratch_operands = 0 : i64, tpu.core_type = #tpu.core_type<tc>, window_params = [{transform_indices = @transform_0, window_bounds = array<i64: 1, 4, 1, 16, 16>}, {transform_indices = @transform_1, window_bounds = array<i64: 1, 1, 16, 64>}]} {
    %c0 = arith.constant 0 : index
    %c0_0 = arith.constant 0 : index
    %c0_1 = arith.constant 0 : index
    %c0_2 = arith.constant 0 : index
    %c0_3 = arith.constant 0 : index
    %0 = vector.load %arg3[%c0, %c0_0, %c0_1, %c0_2, %c0_3] : memref<1x4x1x16x16xf32, #tpu.memory_space<vmem>>, vector<1x1x1x16x16xf32>
    %1 = vector.shape_cast %0 : vector<1x1x1x16x16xf32> to vector<1x16x16xf32>
    %c0_4 = arith.constant 0 : index
    %c1 = arith.constant 1 : index
    %c0_5 = arith.constant 0 : index
    %c0_6 = arith.constant 0 : index
    %c0_7 = arith.constant 0 : index
    %2 = vector.load %arg3[%c0_4, %c1, %c0_5, %c0_6, %c0_7] : memref<1x4x1x16x16xf32, #tpu.memory_space<vmem>>, vector<1x1x1x16x16xf32>
    %3 = vector.shape_cast %2 : vector<1x1x1x16x16xf32> to vector<1x16x16xf32>
    %4 = vector.shape_cast %1 : vector<1x16x16xf32> to vector<1x16x16x1xf32>
    %5 = vector.shape_cast %3 : vector<1x16x16xf32> to vector<1x16x16x1xf32>
    %6 = tpu.concatenate %4, %5 in 3 : vector<1x16x16x1xf32>, vector<1x16x16x1xf32> -> vector<1x16x16x2xf32>
    %7 = vector.shape_cast %6 : vector<1x16x16x2xf32> to vector<1x16x32xf32>
    %c0_8 = arith.constant 0 : index
    %c2 = arith.constant 2 : index
    %c0_9 = arith.constant 0 : index
    %c0_10 = arith.constant 0 : index
    %c0_11 = arith.constant 0 : index
    %8 = vector.load %arg3[%c0_8, %c2, %c0_9, %c0_10, %c0_11] : memref<1x4x1x16x16xf32, #tpu.memory_space<vmem>>, vector<1x1x1x16x16xf32>
    %9 = vector.shape_cast %8 : vector<1x1x1x16x16xf32> to vector<1x16x16xf32>
    %c0_12 = arith.constant 0 : index
    %c3 = arith.constant 3 : index
    %c0_13 = arith.constant 0 : index
    %c0_14 = arith.constant 0 : index
    %c0_15 = arith.constant 0 : index
    %10 = vector.load %arg3[%c0_12, %c3, %c0_13, %c0_14, %c0_15] : memref<1x4x1x16x16xf32, #tpu.memory_space<vmem>>, vector<1x1x1x16x16xf32>
    %11 = vector.shape_cast %10 : vector<1x1x1x16x16xf32> to vector<1x16x16xf32>
    %12 = vector.shape_cast %9 : vector<1x16x16xf32> to vector<1x16x16x1xf32>
    %13 = vector.shape_cast %11 : vector<1x16x16xf32> to vector<1x16x16x1xf32>
    %14 = tpu.concatenate %12, %13 in 3 : vector<1x16x16x1xf32>, vector<1x16x16x1xf32> -> vector<1x16x16x2xf32>
    %15 = vector.shape_cast %14 : vector<1x16x16x2xf32> to vector<1x16x32xf32>
    %16 = tpu.concatenate %7, %15 in 2 : vector<1x16x32xf32>, vector<1x16x32xf32> -> vector<1x16x64xf32>
    %c0_16 = arith.constant 0 : index
    %c0_17 = arith.constant 0 : index
    %c0_18 = arith.constant 0 : index
    %c0_19 = arith.constant 0 : index
    %17 = vector.load %arg4[%c0_16, %c0_17, %c0_18, %c0_19] : memref<1x1x16x64xf32, #tpu.memory_space<vmem>>, vector<1x1x16x64xf32>
    %18 = vector.shape_cast %17 : vector<1x1x16x64xf32> to vector<1x16x64xf32>
    %19 = vector.shape_cast %16 : vector<1x16x64xf32> to vector<1x1x16x64xf32>
    tpu.vector_store %arg4[%c0_16, %c0_17, %c0_18, %c0_19], %19 {strides = array<i32>} : memref<1x1x16x64xf32, #tpu.memory_space<vmem>>, vector<1x1x16x64xf32>,
    return
  }
  func.func @transform_0(%arg0: i32, %arg1: i32, %arg2: i32) -> (i32, i32, i32, i32, i32) {
    %c0_i32 = arith.constant 0 : i32
    %c0_i32_0 = arith.constant 0 : i32
    %c0_i32_1 = arith.constant 0 : i32
    return %arg0, %c0_i32, %arg1, %arg2, %c0_i32_0 : i32, i32, i32, i32, i32
  }
  func.func @transform_1(%arg0: i32, %arg1: i32, %arg2: i32) -> (i32, i32, i32, i32) {
    %c0_i32 = arith.constant 0 : i32
    %c0_i32_0 = arith.constant 0 : i32
    return %arg0, %arg1, %arg2, %c0_i32 : i32, i32, i32, i32
  }
}

</mosaic_0001>

<bundles_post_ra>
// kernel: tpu_custom_call.1
= control target key start
LH: loop header
LB: loop body
LE: loop exit
PB: predicated region body
PF: predicated region fallthrough
CT: control target
= control target key end

     0   :  { %6 = vsyncpa [#allocation3], 0  ;;  %s3964_s0 = inlined_call_operand.hbm [shape: f32[2,4,1,16,16], index: 0, kind: input, shape index: {}]   ;;  %s3965_s1 = inlined_call_operand.hbm [shape: f32[2,1,16,64], index: 1, kind: output, shape index: {}]  }
   0x1   :  { %8 = vsyncpa [#allocation3 + $0x1], 0 }
   0x2   :  { %9 = vsyncpa [#allocation4], 0 }
   0x3   :  { %11 = vsyncpa [#allocation4 + $0x1], 0  ;;  %s2726_s6 = smov 0   ;;  %s2728_s7 = smov 0  }
   0x4   :  { %s2730_s8 = smov 0   ;;  %s2732_s9 = smov 0  }
   0x5   :  { %s2734_s10 = smov 0   ;;  %s2736_s11 = smov 0  }
   0x6 LB: > { %s2418_s12 = sadd.s32 4294967295, %s2693_s11   ;;  %s2419_s13 = sadd.s32 4294967294, %s2693_s11   ;;  %s2693_s11 = sphi %s2736_s11, %s17_s11   ;;  %s2689_s10 = sphi %s2734_s10, %s3977_s10   ;;  %s2685_s9 = sphi %s2732_s9, %s3976_s9   ;;  %s2681_s8 = sphi %s2730_s8, %s3975_s8   ;;  %s2677_s7 = sphi %s2728_s7, %s3974_s7   ;;  %s2673_s6 = sphi %s2726_s6, %s3973_s6  }
   0x7   : > { %s36_s14 = sadd.s32 1, %s2689_s10  ;;  %s47_s15 = sadd.s32 1, %s2681_s8 }
   0x8   : > { %p38_p0 = scmp.ge.s32.totalorder %s36_s14, 2  ;;  %p54_p1 = scmp.ne.s32.totalorder %s2681_s8, %s2677_s7 }
   0x9   : > { %p55_p2 = scmp.eq.s32.totalorder %s2693_s11, 0  ;;  %p60_p3 = scmp.ne.s32.totalorder %s2677_s7, %s2673_s6 }
   0xa   : > { %s3979_s14 = smov (%p38_p0, %s36_s14), 0  ;;  %p61_p5 = scmp.eq.s32.totalorder %s2418_s12, 0 }
   0xb   : > { %p2767_p4 = por %p55_p2, %p54_p1  ;;  %s40_s17 = ssub.s32 %s2689_s10, %s3979_s14 }
   0xc   : > { %p88_p6 = scmp.eq.s32.totalorder %s2418_s12, 1  ;;  %p45_p7 = scmp.eq.s32.totalorder %s40_s17, 0 }
   0xd   : > { %p2773_p8 = por %p61_p5, %p60_p3  ;;  %p94_p10 = scmp.eq.s32.totalorder %s2419_s13, 1 }
   0xe   : > { %p2777_p9 = por %p88_p6, %p54_p1  ;;  %p2421_p12 = scmp.ge.s32.totalorder %s2693_s11, 2 }
   0xf   : > { %s2782_s20 = scalar_select %p45_p7, %s2681_s8, %s47_s15  }
  0x10   : > { %p2784_p11 = por %p94_p10, %p60_p3  ;;  %p2453_p13 = scmp.lt.s32.totalorder %s2693_s11, 2 }
  0x11   : > { %s114_s22 = sand.u32 1, %s2681_s8   ;;  %s2439_s24 = sshll.u32 %s2689_s10, 6 }
  0x12   : > { %s2422_s23 = sshll.u32 %s114_s22, 6  ;;  %s127_s27 = scalar_lea.hbm %s3964_s0, %s2439_s24 }
  0x13   : > { %s118_s28 = scalar_lea.vmem [#allocation2], %s2422_s23  ;;  %s128_s30 = sshll.u32 %s127_s27, 4  ;;  %s129_s30 = int_to_ptr.hbm [resolvable:$true] %s128_s30 }
  0x14   : > { %s130_s29 = sshll.u32 %s118_s28, 4  ;;  %p2446_p0 = pnand %p2453_p13, %p2767_p4  ;;  %s131_s29 = int_to_ptr.vmem [resolvable:$true] %s130_s29 }
  0x15   : > { %p2425_p1 = scmp.ge.s32.totalorder %s2693_s11, 1  ;;  %s115_s2 = scalar_lea.sflag [#allocation3], %s114_s22 }
  0x16   : > { %s2695_s3 = smov 128   ;;  %s2696_s4 = smov 8  }
  0x17   : > { %2448 = dma.hbm_to_vmem [thread:$0]  (!%p2446_p0), %s129_s30, 1024, %s131_s29, %s115_s2, %s2695_s3, %s2695_s3, %s2696_s4  }
  0x18   : > { %p138_p2 = scmp.lt.s32.totalorder %s2693_s11, 3 }
  0x1a   : > { %p139_p3 = pnand %p2425_p1, %p138_p2 }
  0x1b   : > { %s2800_s5 = sand.u32 (!%p139_p3), 1, %s2677_s7  }
  0x1c   : > { %142 = sbr.rel (%p139_p3) target bundleno = 1222 (0x4c6), region = 24  ;;  %s2426_s12 = sshll.u32 (!%p139_p3), %s2800_s5, 6 }
  0x1d   : > { %s145_s13 = scalar_lea.sflag (!%p139_p3), [#allocation3], %s2800_s5  ;;  %s2804_s15 = scalar_lea.vmem (!%p139_p3), [#allocation2], %s2426_s12 }
  0x21   : > { %2664 = dma.done.wait (%p2773_p8), %s145_s13, 1024  }
  0x22   : > { %2666 = vsyncadd (%p2773_p8), %s145_s13, 4294966272  ;;  %v176_v0 = vlaneseq  ;;  %v170_v3 = vld [vmem:[%s2804_s15] sm:$0xff]  ;;  %v2822_v8 = vld [vmem:[%s2804_s15 + $0x8] sm:$0xff]  ;;  %vm591_vm0 = vcmask 7168   ;;  %vm625_vm1 = vcmask 1047556   ;;  %s2699_s16 = smov 6  }
  0x23   : > { %v201_v4 = vperm.slane %v170_v3, 2  ;;  %v188_v5 = vperm.slane %v170_v3, 1  ;;  %v175_v6 = vperm.slane %v170_v3, 0  ;;  %v253_v7 = vperm.slane %v170_v3, 6  ;;  %v2826_v10 = vld [vmem:[%s2804_s15 + $0x10] sm:$0xff]  ;;  %v2837_v14 = vld [vmem:[%s2804_s15 + $0x18] sm:$0xff] }
  0x24   : > { %v2810_v1 = vshrl.u32 %v176_v0, 7  ;;  %v318_v9 = vperm.slane %v2822_v8, 3  ;;  %v214_v11 = vperm.slane %v170_v3, 3  ;;  %v383_v12 = vperm.slane %v2826_v10, 0  ;;  %s2700_s17 = smov 2   ;;  %s2701_s18 = smov 4  }
  0x25   : > { %v448_v13 = vperm.slane %v2826_v10, 5  ;;  %v240_v15 = vperm.slane %v170_v3, 5  ;;  %v513_v16 = vperm.slane %v2837_v14, 2  ;;  %v227_v17 = vperm.slane %v170_v3, 4  ;;  %s2702_s22 = smov 8   ;;  %s2703_s23 = smov 10  }
  0x26   : > { %2526 = vset.pattern.permute.xlu2 %v2810_v1  ;;  %2525 = vset.pattern.permute.xlu1 %v2810_v1  ;;  %v2815_v2 = vadd.s32 8, %v2810_v1  ;;  %v578_v18 = vperm.slane %v2837_v14, 7  ;;  %v266_v19 = vperm.slane %v170_v3, 7  ;;  %v279_v20 = vperm.slane %v2822_v8, 0  ;;  %s2704_s24 = smov 12   ;;  %s2705_s25 = smov 14  }
  0x27   : > { %v292_v21 = vperm.slane %v2822_v8, 1  ;;  %v305_v22 = vperm.slane %v2822_v8, 2  ;;  %v357_v23 = vperm.slane %v2822_v8, 6  ;;  %v422_v24 = vperm.slane %v2826_v10, 3  ;;  %s2706_s26 = smov 16   ;;  %s2707_s27 = smov 18  }
  0x28   : > { %2524 = vset.pattern.permute.xlu0 %v2815_v2  ;;  %v487_v25 = vperm.slane %v2837_v14, 0  ;;  %v331_v26 = vperm.slane %v2822_v8, 4  ;;  %v552_v27 = vperm.slane %v2837_v14, 5  ;;  %v344_v28 = vperm.slane %v2822_v8, 5  ;;  %s2708_s28 = smov 20   ;;  %s2709_s29 = smov 22  }
  0x29   : > { %v370_v31 = vperm.slane %v2822_v8, 7  ;;  %v396_v37 = vperm.slane %v2826_v10, 1  ;;  %v409_v39 = vperm.slane %v2826_v10, 2  ;;  %v435_v42 = vperm.slane %v2826_v10, 4  ;;  %s2710_s30 = smov 24   ;;  %s2711_s2 = smov 26  }
  0x2a   : > { %v461_v49 = vperm.slane %v2826_v10, 6  ;;  %v474_v52 = vperm.slane %v2826_v10, 7  ;;  %v500_v57 = vperm.slane %v2837_v14, 1  ;;  %v526_v63 = vperm.slane %v2837_v14, 3  ;;  %s2712_s3 = smov 28   ;;  %s2713_s4 = smov 30  }
  0x2b   : > { %vm1193_vm2 = vcmask 15360   ;;  %vm1196_vm3 = vcmask 31744   ;;  %vm1199_vm4 = vcmask 48128   ;;  %vm1202_vm5 = vcmask 64512   ;;  %s2714_s12 = smov 32   ;;  %s2427_s13 = sshll.u32 %s2800_s5, 4 }
  0x2c   : > { %vm1205_vm6 = vcmask 80896   ;;  %vm1208_vm7 = vcmask 97280   ;;  %vm1211_vm8 = vcmask 113664   ;;  %vm1214_vm9 = vcmask 130048  }
  0x2d   : > { %vm1217_vm10 = vcmask 146432   ;;  %vm1220_vm11 = vcmask 162816   ;;  %vm3966_vm12 = vcmask 179200   ;;  %vm1226_vm13 = vcmask 195584  }
  0x2e   : > { %206 = vperm.xlu2 %2526, %v201_v4   ;;  %193 = vperm.xlu1 %2525, %v188_v5   ;;  %vm1229_vm14 = vcmask 211968   ;;  %vm1232_vm15 = vcmask 228352  }
  0x30   : > { %186 = vperm.xlu0 %2524, %v175_v6  }
  0x36   : > { %2529 = vset.pattern.permute.xlu2 %v2815_v2  ;;  %2527 = vset.pattern.permute.xlu1 %v2815_v2 }
  0x38   : > { %264 = vperm.xlu0 %2524, %v253_v7  }
  0x3e   : > { %212 = vperm.xlu2 %2529, %v201_v4   ;;  %199 = vperm.xlu1 %2527, %v188_v5   ;;  %v539_v4 = vperm.slane %v2837_v14, 4 }
  0x40   : > { %329 = vperm.xlu0 %2524, %v318_v9  }
  0x46   : > { %225 = vperm.xlu2 %2529, %v214_v11   ;;  %2528 = vset.pattern.permute.xlu1 %v2810_v1 }
  0x48   : > { %394 = vperm.xlu0 %2524, %v383_v12  }
  0x4e   : > { %2531 = vset.pattern.permute.xlu2 %v2810_v1  ;;  %219 = vperm.xlu1 %2528, %v214_v11   ;;  %v565_v11 = vperm.slane %v2837_v14, 6 }
  0x50   : > { %459 = vperm.xlu0 %2524, %v448_v13  }
  0x56   : > { %245 = vperm.xlu2 %2531, %v240_v15   ;;  %2530 = vset.pattern.permute.xlu1 %v2815_v2 }
  0x58   : > { %524 = vperm.xlu0 %2524, %v513_v16  }
  0x5e   : > { %258 = vperm.xlu2 %2531, %v253_v7   ;;  %238 = vperm.xlu1 %2530, %v227_v17  }
  0x60   : > { %589 = vperm.xlu0 %2524, %v578_v18  }
  0x66   : > { %2533 = vset.pattern.permute.xlu2 %v2815_v2  ;;  %251 = vperm.xlu1 %2530, %v240_v15  }
  0x68   : > { %2552 = vset.pattern.permute.xlu0 %v2810_v1 }
  0x6e   : > { %277 = vperm.xlu2 %2533, %v266_v19   ;;  %2532 = vset.pattern.permute.xlu1 %v2810_v1 }
  0x70   : > { %180 = vperm.xlu0 %2552, %v175_v6  }
  0x76   : > { %290 = vperm.xlu2 %2533, %v279_v20   ;;  %271 = vperm.xlu1 %2532, %v266_v19  }
  0x78   : > { %232 = vperm.xlu0 %2552, %v227_v17  }
  0x7e   : > { %2535 = vset.pattern.permute.xlu2 %v2810_v1  ;;  %284 = vperm.xlu1 %2532, %v279_v20  }
  0x80   : > { %297 = vperm.xlu0 %2552, %v292_v21  }
  0x86   : > { %310 = vperm.xlu2 %2535, %v305_v22   ;;  %2534 = vset.pattern.permute.xlu1 %v2815_v2 }
  0x88   : > { %362 = vperm.xlu0 %2552, %v357_v23   ;;  %v2876_v35 = vpop.permute.xlu2 %206 }
  0x8e   : > { %323 = vperm.xlu2 %2535, %v318_v9   ;;  %303 = vperm.xlu1 %2534, %v292_v21  }
  0x90   : > { %427 = vperm.xlu0 %2552, %v422_v24  }
  0x96   : > { %2537 = vset.pattern.permute.xlu2 %v2815_v2  ;;  %316 = vperm.xlu1 %2534, %v305_v22  }
  0x98   : > { %492 = vperm.xlu0 %2552, %v487_v25   ;;  %v2881_v36 = vpop.permute.xlu2 %212 }
  0x9e   : > { %342 = vperm.xlu2 %2537, %v331_v26   ;;  %2536 = vset.pattern.permute.xlu1 %v2810_v1 }
  0xa0   : > { %557 = vperm.xlu0 %2552, %v552_v27   ;;  %v2885_v38 = vpop.permute.xlu2 %225  ;;  %v2890_v41 = vpop.permute.xlu1 %193 }
  0xa2   : > { %v187_v29 = vpop.permute.xlu0 %186 }
  0xa6   : > { %355 = vperm.xlu2 %2537, %v344_v28   ;;  %336 = vperm.xlu1 %2536, %v331_v26  }
  0xaa   : > { %v2866_v30 = vpop.permute.xlu0 %264 }
  0xae   : > { %2539 = vset.pattern.permute.xlu2 %v2810_v1  ;;  %349 = vperm.xlu1 %2536, %v344_v28  }
  0xb0   : > { %v2888_v40 = vpop.permute.xlu2 %245  ;;  %v2894_v43 = vpop.permute.xlu1 %199 }
  0xb2   : > { %v2870_v32 = vpop.permute.xlu0 %329 }
  0xb6   : > { %375 = vperm.xlu2 %2539, %v370_v31   ;;  %2538 = vset.pattern.permute.xlu1 %v2815_v2 }
  0xb8   : > { %v2896_v44 = vpop.permute.xlu2 %258 }
  0xba   : > { %v395_v33 = vpop.permute.xlu0 %394 }
  0xbb   : > { %v2874_v34 = vsel %vm591_vm0, %v187_v29, %v395_v33 }
  0xbc   : > { %v851_v26 = vrot.slane %v2874_v34, 4 }
  0xbe   : > { %388 = vperm.xlu2 %2539, %v383_v12   ;;  %368 = vperm.xlu1 %2538, %v357_v23  }
  0xc0   : > { %v2899_v45 = vpop.permute.xlu1 %219 }
  0xc2   : > { %v460_v0 = vpop.permute.xlu0 %459 }
  0xc6   : > { %2541 = vset.pattern.permute.xlu2 %v2815_v2  ;;  %381 = vperm.xlu1 %2538, %v370_v31  }
  0xc8   : > { %v2901_v46 = vpop.permute.xlu2 %277 }
  0xca   : > { %v2950_v7 = vpop.permute.xlu0 %524 }
  0xce   : > { %407 = vperm.xlu2 %2541, %v396_v37   ;;  %2540 = vset.pattern.permute.xlu1 %v2810_v1 }
  0xd0   : > { %v2905_v47 = vpop.permute.xlu1 %238  ;;  %v2907_v48 = vpop.permute.xlu2 %290 }
  0xd2   : > { %v2955_v10 = vpop.permute.xlu0 %589 }
  0xd6   : > { %420 = vperm.xlu2 %2541, %v409_v39   ;;  %401 = vperm.xlu1 %2540, %v396_v37  }
  0xd8   : > { %v2911_v50 = vpop.permute.xlu1 %251 }
  0xde   : > { %2543 = vset.pattern.permute.xlu2 %v2810_v1  ;;  %414 = vperm.xlu1 %2540, %v409_v39  }
  0xe0   : > { %v2913_v51 = vpop.permute.xlu2 %310 }
  0xe2   : > { %v2963_v15 = vpop.permute.xlu0 %180 }
  0xe6   : > { %440 = vperm.xlu2 %2543, %v435_v42   ;;  %2542 = vset.pattern.permute.xlu1 %v2815_v2 }
  0xe8   : > { %v2917_v53 = vpop.permute.xlu1 %271  ;;  %v2919_v54 = vpop.permute.xlu2 %323 }
  0xea   : > { %v2973_v19 = vpop.permute.xlu0 %232 }
  0xee   : > { %453 = vperm.xlu2 %2543, %v448_v13   ;;  %433 = vperm.xlu1 %2542, %v422_v24   ;;  %v2697_v24 = vmov 1983009808  }
  0xf0   : > { %v2922_v55 = vpop.permute.xlu1 %284 }
  0xf2   : > { %v2978_v28 = vpop.permute.xlu0 %297 }
  0xf6   : > { %2545 = vset.pattern.permute.xlu2 %v2815_v2  ;;  %446 = vperm.xlu1 %2542, %v435_v42  }
  0xf8   : > { %v2924_v56 = vpop.permute.xlu2 %342 }
  0xfe   : > { %472 = vperm.xlu2 %2545, %v461_v49   ;;  %2544 = vset.pattern.permute.xlu1 %v2810_v1 }
 0x100   : > { %v2928_v58 = vpop.permute.xlu1 %303  ;;  %v2930_v59 = vpop.permute.xlu2 %355 }
 0x106   : > { %485 = vperm.xlu2 %2545, %v474_v52   ;;  %466 = vperm.xlu1 %2544, %v461_v49  }
 0x108   : > { %v2936_v60 = vpop.permute.xlu1 %316 }
 0x10e   : > { %2547 = vset.pattern.permute.xlu2 %v2810_v1  ;;  %479 = vperm.xlu1 %2544, %v474_v52  }
 0x110   : > { %v2938_v61 = vpop.permute.xlu2 %375 }
 0x116   : > { %505 = vperm.xlu2 %2547, %v500_v57   ;;  %2546 = vset.pattern.permute.xlu1 %v2815_v2 }
 0x118   : > { %v2941_v62 = vpop.permute.xlu1 %336  ;;  %v2944_v3 = vpop.permute.xlu2 %388 }
 0x11e   : > { %518 = vperm.xlu2 %2547, %v513_v16   ;;  %498 = vperm.xlu1 %2546, %v487_v25   ;;  %v630_v25 = vunpack.c.l.s4 %v2697_v24  ;;  %v3004_v24 = vpop.permute.xlu0 %362 }
 0x120   : > { %v2948_v5 = vpop.permute.xlu1 %349  ;;  %v2987_v31 = vunpack.c.0.s8 %v630_v25 }
 0x126   : > { %2549 = vset.pattern.permute.xlu2 %v2815_v2  ;;  %511 = vperm.xlu1 %2546, %v500_v57  }
 0x128   : > { %v408_v6 = vpop.permute.xlu2 %407 }
 0x129   : > { %v595_v14 = vsel %vm591_vm0, %v2894_v43, %v408_v6 }
 0x12a   : > { %v863_v29 = vrot.slane %v595_v14, 4 }
 0x12e   : > { %537 = vperm.xlu2 %2549, %v526_v63   ;;  %2548 = vset.pattern.permute.xlu1 %v2810_v1 }
 0x130   : > { %v2952_v8 = vpop.permute.xlu1 %368  ;;  %v421_v9 = vpop.permute.xlu2 %420 }
 0x131   : > { %v597_v20 = vsel %vm591_vm0, %v2881_v36, %v421_v9 }
 0x132   : > { %v849_v23 = vrot.slane %v597_v20, 4  ;;  %v852_v37 = vsel %vm625_vm1, %v597_v20, %v851_v26 }
 0x136   : > { %550 = vperm.xlu2 %2549, %v539_v4   ;;  %531 = vperm.xlu1 %2548, %v526_v63  }
 0x138   : > { %v2958_v12 = vpop.permute.xlu1 %381 }
 0x13e   : > { %2551 = vset.pattern.permute.xlu2 %v2810_v1  ;;  %544 = vperm.xlu1 %2548, %v539_v4   ;;  %v2698_v4 = vmov 1934713408  }
 0x13f   : > { %v678_v6 = vunpack.c.l.s4 %v2698_v4 }
 0x140   : > { %v2960_v13 = vpop.permute.xlu2 %440 }
 0x146   : > { %570 = vperm.xlu2 %2551, %v565_v11   ;;  %2550 = vset.pattern.permute.xlu1 %v2815_v2 }
 0x148   : > { %v2965_v16 = vpop.permute.xlu1 %401  ;;  %v2971_v17 = vpop.permute.xlu2 %453 }
 0x14e   : > { %583 = vperm.xlu2 %2551, %v578_v18   ;;  %563 = vperm.xlu1 %2550, %v552_v27   ;;  %v850_v18 = vsel %vm625_vm1, %v849_v23, %v2874_v34  ;;  %v603_v27 = vsel %vm591_vm0, %v2911_v50, %v460_v0 }
 0x14f   : > { %v856_v43 = vperm.slane %v850_v18, %v2987_v31  ;;  %v887_v50 = vrot.slane %v603_v27, 4 }
 0x150   : > { %v415_v21 = vpop.permute.xlu1 %414 }
 0x151   : > { %v899_v20 = vrot.slane %v856_v43, 4 }
 0x156   : > { %576 = vperm.xlu1 %2550, %v565_v11  }
 0x158   : > { %v473_v22 = vpop.permute.xlu2 %472 }
 0x15e   : > { %2553 = vset.pattern.permute.xlu1 %v2810_v1 }
 0x160   : > { %v486_v33 = vpop.permute.xlu2 %485  ;;  %v434_v36 = vpop.permute.xlu1 %433 }
 0x161   : > { %v607_v39 = vsel %vm591_vm0, %v2901_v46, %v486_v33  ;;  %v599_v42 = vsel %vm591_vm0, %v2885_v38, %v434_v36  ;;  %v860_v46 = vperm.slane %v852_v37, %v2987_v31  ;;  %v605_v38 = vsel %vm591_vm0, %v2866_v30, %v473_v22 }
 0x162   : > { %v885_v49 = vrot.slane %v607_v39, 4  ;;  %v861_v34 = vrot.slane %v599_v42, 4  ;;  %v864_v52 = vsel %vm625_vm1, %v599_v42, %v863_v29  ;;  %v888_v9 = vsel %vm625_vm1, %v607_v39, %v887_v50 }
 0x163   : > { %v872_v57 = vperm.slane %v864_v52, %v2987_v31  ;;  %v873_v18 = vrot.slane %v605_v38, 4  ;;  %v3008_v29 = vunpack.c.0.s8 %v678_v6  ;;  %v911_v30 = vrot.slane %v860_v46, 4 }
 0x164   : > { %v886_v63 = vsel %vm625_vm1, %v885_v49, %v603_v27  ;;  %v862_v0 = vsel %vm625_vm1, %v861_v34, %v595_v14  ;;  %v896_v14 = vperm.slane %v888_v9, %v2987_v31 }
 0x165   : > { %v868_v11 = vperm.slane %v862_v0, %v2987_v31  ;;  %v909_v23 = vrot.slane %v872_v57, 4  ;;  %v892_v25 = vperm.slane %v886_v63, %v2987_v31  ;;  %v912_v63 = vsel %vm625_vm1, %v872_v57, %v911_v30 }
 0x166   : > { %v933_v0 = vrot.slane %v896_v14, 4 }
 0x167   : > { %v897_v26 = vrot.slane %v868_v11, 4  ;;  %v900_v33 = vsel %vm625_vm1, %v868_v11, %v899_v20  ;;  %v910_v49 = vsel %vm625_vm1, %v909_v23, %v860_v46  ;;  %v921_v34 = vrot.slane %v892_v25, 4 }
 0x168   : > { %v447_v27 = vpop.permute.xlu1 %446  ;;  %v908_v50 = vperm.slane %v900_v33, %v3008_v29  ;;  %v916_v9 = vperm.slane %v910_v49, %v3008_v29  ;;  %v3026_v46 = vsel %vm591_vm0, %v2876_v35, %v415_v21  ;;  %v920_v23 = vperm.slane %v912_v63, %v3008_v29  ;;  %v428_v21 = vpop.permute.xlu0 %427 }
 0x169   : > { %v601_v22 = vsel %vm591_vm0, %v2905_v47, %v447_v27  ;;  %v898_v36 = vsel %vm625_vm1, %v897_v26, %v856_v43 }
 0x16a   : > { %v874_v37 = vsel %vm625_vm1, %v873_v18, %v601_v22  ;;  %v875_v39 = vrot.slane %v601_v22, 4  ;;  %v904_v42 = vperm.slane %v898_v36, %v3008_v29  ;;  %v955_v36 = vrot.slane %v916_v9, 4 }
 0x16b   : > { %v880_v52 = vperm.slane %v874_v37, %v2987_v31  ;;  %v624_v37 = vrot.slane %v3026_v46, 4  ;;  %v959_v63 = vrot.slane %v920_v23, 4 }
 0x16c   : > { %v876_v4 = vsel %vm625_vm1, %v605_v38, %v875_v39  ;;  %v947_v20 = vrot.slane %v904_v42, 4  ;;  %v951_v38 = vrot.slane %v908_v50, 4 }
 0x16d   : > { %v884_v47 = vperm.slane %v876_v4, %v2987_v31  ;;  %v923_v43 = vrot.slane %v880_v52, 4  ;;  %v922_v6 = vsel %vm625_vm1, %v921_v34, %v880_v52 }
 0x16e   : > { %v928_v11 = vperm.slane %v922_v6, %v3008_v29 }
 0x16f   : > { %v935_v57 = vrot.slane %v884_v47, 4  ;;  %v924_v26 = vsel %vm625_vm1, %v892_v25, %v923_v43  ;;  %v934_v18 = vsel %vm625_vm1, %v933_v0, %v884_v47 }
 0x170   : > { %v945_v27 = vrot.slane %v928_v11, 4  ;;  %v3033_v33 = vsel %vm625_vm1, %v928_v11, %v947_v20  ;;  %v932_v30 = vperm.slane %v924_v26, %v3008_v29  ;;  %v940_v35 = vperm.slane %v934_v18, %v3008_v29 }
 0x171   : > { %v936_v22 = vsel %vm625_vm1, %v896_v14, %v935_v57  ;;  %v3051_v14 = vsel %vm591_vm0, %v2899_v45, %v428_v21  ;;  %v3072_v45 = vsel %vm591_vm0, %v2890_v41, %v2965_v16  ;;  %v3089_v41 = vsel %vm591_vm0, %v2973_v19, %v2960_v13 }
 0x172   : > { %v3040_v39 = vsel %vm625_vm1, %v945_v27, %v904_v42  ;;  %v3043_v25 = vsel %vm625_vm1, %v932_v30, %v951_v38  ;;  %v953_v49 = vrot.slane %v940_v35, 4  ;;  %v949_v34 = vrot.slane %v932_v30, 4  ;;  %v506_v38 = vpop.permute.xlu2 %505 }
 0x173   : > { %v944_v52 = vperm.slane %v936_v22, %v3008_v29  ;;  %v3047_v0 = vsel %vm625_vm1, %v940_v35, %v955_v36  ;;  %v3059_v42 = vsel %vm591_vm0, %v2963_v15, %v2944_v3  ;;  %v637_v3 = vrot.slane %v3051_v14, 4 }
 0x174   : > { %v3054_v4 = vsel %vm625_vm1, %v953_v49, %v916_v9  ;;  %v3062_v47 = vsel %vm625_vm1, %v949_v34, %v908_v50  ;;  %v626_v11 = vsel %vm625_vm1, %v624_v37, %v3059_v42  ;;  %v3104_v13 = vsel %vm591_vm0, %v2888_v40, %v2971_v17 }
 0x175   : > { %v957_v43 = vrot.slane %v944_v52, 4  ;;  %v3065_v6 = vsel %vm625_vm1, %v944_v52, %v959_v63  ;;  %v632_v50 = vperm.slane %v626_v11, %v2987_v31  ;;  %v638_v57 = vsel %vm625_vm1, %v637_v3, %v3072_v45 }
 0x176   : > { %v644_v16 = vperm.slane %v638_v57, %v2987_v31 }
 0x177   : > { %v3075_v9 = vsel %vm625_vm1, %v957_v43, %v920_v23  ;;  %v675_v23 = vrot.slane %v632_v50, 4 }
 0x178   : > { %v467_v15 = vpop.permute.xlu1 %466 }
 0x179   : > { %v3081_v20 = vsel %vm591_vm0, %v2896_v44, %v467_v15  ;;  %v673_v44 = vrot.slane %v644_v16, 4  ;;  %v676_v21 = vsel %vm625_vm1, %v644_v16, %v675_v23 }
 0x17a   : > { %v649_v26 = vrot.slane %v3081_v20, 4  ;;  %v684_v37 = vperm.slane %v676_v21, %v3008_v29  ;;  %v519_v34 = vpop.permute.xlu2 %518  ;;  %v493_v21 = vpop.permute.xlu0 %492 }
 0x17b   : > { %v674_v19 = vsel %vm625_vm1, %v673_v44, %v632_v50 }
 0x17c   : > { %v650_v18 = vsel %vm625_vm1, %v649_v26, %v3089_v41  ;;  %v680_v52 = vperm.slane %v674_v19, %v3008_v29  ;;  %v727_v40 = vrot.slane %v684_v37, 4 }
 0x17d   : > { %v656_v30 = vperm.slane %v650_v18, %v2987_v31 }
 0x17e   : > { %v723_v50 = vrot.slane %v680_v52, 4 }
 0x17f   : > { %v699_v49 = vrot.slane %v656_v30, 4 }
 0x180   : > { %v480_v27 = vpop.permute.xlu1 %479 }
 0x181   : > { %v3097_v35 = vsel %vm591_vm0, %v2917_v53, %v480_v27 }
 0x182   : > { %v661_v22 = vrot.slane %v3097_v35, 4 }
 0x184   : > { %v662_v36 = vsel %vm625_vm1, %v661_v22, %v3104_v13  ;;  %v612_v22 = vsel %vm591_vm0, %v2913_v51, %v519_v34 }
 0x185   : > { %v668_v53 = vperm.slane %v662_v36, %v2987_v31 }
 0x187   : > { %v697_v63 = vrot.slane %v668_v53, 4  ;;  %v700_v43 = vsel %vm625_vm1, %v668_v53, %v699_v49  ;;  %v737_v49 = vrot.slane %v612_v22, 4  ;;  %v558_v53 = vpop.permute.xlu0 %557 }
 0x188   : > { %v708_v11 = vperm.slane %v700_v43, %v3008_v29  ;;  %v3120_v16 = vpop.permute.xlu2 %537 }
 0x189   : > { %v698_v17 = vsel %vm625_vm1, %v697_v63, %v656_v30  ;;  %v610_v63 = vsel %vm591_vm0, %v2978_v28, %v506_v38 }
 0x18a   : > { %v728_v3 = vsel %vm625_vm1, %v708_v11, %v727_v40  ;;  %v704_v15 = vperm.slane %v698_v17, %v3008_v29  ;;  %v725_v18 = vrot.slane %v708_v11, 4  ;;  %v618_v11 = vsel %vm591_vm0, %v2948_v5, %v558_v53 }
 0x18b   : > { %1091 = vrot.lane.b32.xlu0 %v728_v3, %s2699_s16  ;;  %v751_v3 = vrot.slane %v610_v63, 4  ;;  %v775_v28 = vrot.slane %v618_v11, 4  ;;  %v651_v5 = vrot.slane %v3089_v41, 4 }
 0x18c   : > { %v721_v57 = vrot.slane %v704_v15, 4  ;;  %v724_v26 = vsel %vm625_vm1, %v704_v15, %v723_v50  ;;  %v726_v27 = vsel %vm625_vm1, %v725_v18, %v684_v37  ;;  %v639_v37 = vrot.slane %v3072_v45, 4 }
 0x18d   : > { %1075 = vrot.lane.b32.xlu1 %v724_v26, %s2700_s17  ;;  %v663_v18 = vrot.slane %v3104_v13, 4  ;;  %v652_v41 = vsel %vm625_vm1, %v3081_v20, %v651_v5 }
 0x18e   : > { %v3123_v23 = vsel %vm625_vm1, %v721_v57, %v680_v52  ;;  %v608_v52 = vsel %vm591_vm0, %v2922_v55, %v493_v21  ;;  %v640_v38 = vsel %vm625_vm1, %v3051_v14, %v639_v37 }
 0x18f   : > { %v738_v43 = vsel %vm625_vm1, %v737_v49, %v608_v52  ;;  %v739_v50 = vrot.slane %v608_v52, 4  ;;  %v3160_v49 = vperm.slane %v640_v38, %v2987_v31  ;;  %v664_v52 = vsel %vm625_vm1, %v3097_v35, %v663_v18 }
 0x190   : > { %v3127_v44 = vpop.permute.xlu1 %498  ;;  %v3129_v30 = vpop.permute.xlu2 %550  ;;  %v744_v55 = vperm.slane %v738_v43, %v2987_v31 }
 0x191   : > { %v740_v37 = vsel %vm625_vm1, %v612_v22, %v739_v50 }
 0x192   : > { %v787_v14 = vrot.slane %v744_v55, 4 }
 0x195   : > { %1083 = vrot.lane.b32.xlu1 %v726_v27, %s2701_s18 }
 0x198   : > { %v3133_v19 = vpop.permute.xlu1 %511 }
 0x1a0   : > { %v571_v36 = vpop.permute.xlu2 %570 }
 0x1a1   : > { %v620_v27 = vsel %vm591_vm0, %v3004_v24, %v571_v36 }
 0x1a8   : > { %v584_v40 = vpop.permute.xlu2 %583  ;;  %v532_v51 = vpop.permute.xlu1 %531 }
 0x1a9   : > { %v622_v34 = vsel %vm591_vm0, %v2938_v61, %v584_v40  ;;  %v614_v17 = vsel %vm591_vm0, %v2919_v54, %v532_v51  ;;  %v627_v54 = vrot.slane %v3059_v42, 4 }
 0x1aa   : > { %v773_v45 = vrot.slane %v622_v34, 4  ;;  %v749_v15 = vrot.slane %v614_v17, 4  ;;  %v752_v61 = vsel %vm625_vm1, %v614_v17, %v751_v3  ;;  %v776_v53 = vsel %vm625_vm1, %v622_v34, %v775_v28 }
 0x1ab   : > { %v3169_v13 = vperm.slane %v752_v61, %v2987_v31  ;;  %v628_v36 = vsel %vm625_vm1, %v3026_v46, %v627_v54  ;;  %v784_v40 = vperm.slane %v776_v53, %v2987_v31  ;;  %v672_v34 = vperm.slane %v664_v52, %v2987_v31 }
 0x1ac   : > { %v774_v57 = vsel %vm625_vm1, %v773_v45, %v618_v11  ;;  %v750_v26 = vsel %vm625_vm1, %v749_v15, %v610_v63  ;;  %v761_v63 = vrot.slane %v620_v27, 4  ;;  %v660_v11 = vperm.slane %v652_v41, %v2987_v31 }
 0x1ad   : > { %v756_v21 = vperm.slane %v750_v26, %v2987_v31  ;;  %v780_v42 = vperm.slane %v774_v57, %v2987_v31  ;;  %v797_v45 = vrot.slane %v3169_v13, 4  ;;  %v685_v28 = vrot.slane %v3160_v49, 4 }
 0x1ae   : > { %v821_v5 = vrot.slane %v784_v40, 4  ;;  %v711_v54 = vrot.slane %v660_v11, 4  ;;  %v709_v18 = vrot.slane %v672_v34, 4 }
 0x1af   : > { %v785_v24 = vrot.slane %v756_v21, 4  ;;  %v788_v20 = vsel %vm625_vm1, %v756_v21, %v787_v14  ;;  %v809_v3 = vrot.slane %v780_v42, 4 }
 0x1b0   : > { %v545_v43 = vpop.permute.xlu1 %544  ;;  %v796_v50 = vperm.slane %v788_v20, %v3008_v29  ;;  %v712_v20 = vsel %vm625_vm1, %v672_v34, %v711_v54 }
 0x1b1   : > { %v616_v35 = vsel %vm591_vm0, %v2941_v62, %v545_v43  ;;  %v786_v51 = vsel %vm625_vm1, %v785_v24, %v744_v55  ;;  %v636_v62 = vperm.slane %v628_v36, %v2987_v31  ;;  %v748_v55 = vperm.slane %v740_v37, %v2987_v31 }
 0x1b2   : > { %v762_v17 = vsel %vm625_vm1, %v761_v63, %v616_v35  ;;  %v763_v46 = vrot.slane %v616_v35, 4  ;;  %v792_v22 = vperm.slane %v786_v51, %v3008_v29  ;;  %v839_v53 = vrot.slane %v796_v50, 4 }
 0x1b3   : > { %v768_v15 = vperm.slane %v762_v17, %v2987_v31  ;;  %v798_v52 = vsel %vm625_vm1, %v797_v45, %v748_v55  ;;  %v686_v43 = vsel %vm625_vm1, %v685_v28, %v636_v62  ;;  %v687_v17 = vrot.slane %v636_v62, 4 }
 0x1b4   : > { %v764_v38 = vsel %vm625_vm1, %v620_v27, %v763_v46  ;;  %v835_v14 = vrot.slane %v792_v22, 4  ;;  %v3206_v35 = vperm.slane %v798_v52, %v3008_v29  ;;  %v692_v28 = vperm.slane %v686_v43, %v3008_v29 }
 0x1b5   : > { %v772_v57 = vperm.slane %v764_v38, %v2987_v31  ;;  %v811_v26 = vrot.slane %v768_v15, 4  ;;  %v810_v61 = vsel %vm625_vm1, %v809_v3, %v768_v15  ;;  %v710_v3 = vsel %vm625_vm1, %v709_v18, %v660_v11 }
 0x1b6   : > { %v816_v21 = vperm.slane %v810_v61, %v3008_v29  ;;  %v3218_v38 = vperm.slane %v712_v20, %v3008_v29  ;;  %v716_v62 = vperm.slane %v710_v3, %v3008_v29  ;;  %v688_v11 = vsel %vm625_vm1, %v3160_v49, %v687_v17 }
 0x1b7   : > { %v812_v41 = vsel %vm625_vm1, %v780_v42, %v811_v26  ;;  %v822_v24 = vsel %vm625_vm1, %v821_v5, %v772_v57  ;;  %v823_v46 = vrot.slane %v772_v57, 4  ;;  %v731_v26 = vrot.slane %v692_v28, 4 }
 0x1b8   : > { %v836_v27 = vsel %vm625_vm1, %v816_v21, %v835_v14  ;;  %v833_v36 = vrot.slane %v816_v21, 4  ;;  %v820_v37 = vperm.slane %v812_v41, %v3008_v29  ;;  %v3199_v63 = vperm.slane %v822_v24, %v3008_v29 }
 0x1b9   : > { %1077 = vrot.lane.b32.xlu2 %v836_v27, %s2700_s17  ;;  %v733_v61 = vrot.slane %v3218_v38, 4  ;;  %v799_v54 = vrot.slane %v748_v55, 4  ;;  %v3230_v18 = vsel %vm591_vm0, %v2870_v32, %v3120_v16  ;;  %v732_v21 = vsel %vm625_vm1, %v716_v62, %v731_v26 }
 0x1ba   : > { %v840_v42 = vsel %vm625_vm1, %v820_v37, %v839_v53  ;;  %v841_v51 = vrot.slane %v3199_v63, 4  ;;  %v3212_v45 = vsel %vm625_vm1, %v833_v36, %v792_v22  ;;  %v837_v34 = vrot.slane %v820_v37, 4 }
 0x1bb   : > { %1093 = vrot.lane.b32.xlu1 %v840_v42, %s2699_s16  ;;  %v824_v22 = vsel %vm625_vm1, %v784_v40, %v823_v46  ;;  %v3235_v49 = vperm.slane %v688_v11, %v3008_v29  ;;  %v800_v32 = vsel %vm625_vm1, %v3169_v13, %v799_v54  ;;  %v973_v16 = vrot.slane %v3230_v18, 4 }
 0x1bc   : > { %v842_v15 = vsel %vm625_vm1, %v841_v51, %v3206_v35  ;;  %v838_v57 = vsel %vm625_vm1, %v837_v34, %v796_v50  ;;  %v832_v40 = vperm.slane %v824_v22, %v3008_v29  ;;  %v3241_v50 = vsel %vm591_vm0, %v2928_v58, %v3133_v19 }
 0x1bd   : > { %1101 = vrot.lane.b32.xlu0 %v842_v15, %s2702_s22  ;;  %v734_v55 = vsel %vm625_vm1, %v733_v61, %v3235_v49  ;;  %v729_v14 = vrot.slane %v716_v62, 4  ;;  %v623_v41 = vsel %vm591_vm0, %v2958_v12, %v2955_v10  ;;  %v3256_v58 = vsel %vm591_vm0, %v2936_v60, %v2950_v7 }
 0x1be   : > { %v974_v19 = vsel %vm625_vm1, %v973_v16, %v3241_v50  ;;  %v808_v13 = vperm.slane %v800_v32, %v3008_v29  ;;  %v845_v53 = vrot.slane %v832_v40, 4  ;;  %v997_v24 = vrot.slane %v623_v41, 4 }
 0x1bf   : > { %v730_v10 = vsel %vm625_vm1, %v729_v14, %v692_v28  ;;  %v961_v12 = vrot.slane %v3256_v58, 4  ;;  %v609_v60 = vsel %vm591_vm0, %v2907_v48, %v3127_v44  ;;  %v980_v7 = vperm.slane %v974_v19, %v2987_v31 }
 0x1c0   : > { %v564_v5 = vpop.permute.xlu1 %563  ;;  %v846_v43 = vsel %vm625_vm1, %v845_v53, %v808_v13  ;;  %v847_v20 = vrot.slane %v808_v13, 4  ;;  %v617_v42 = vsel %vm591_vm0, %v2924_v56, %v3129_v30  ;;  %v843_v3 = vrot.slane %v3206_v35, 4 }
 0x1c1   : > { %1085 = vrot.lane.b32.xlu2 %v838_v57, %s2701_s18  ;;  %v619_v52 = vsel %vm591_vm0, %v2930_v59, %v564_v5  ;;  %v962_v48 = vsel %vm625_vm1, %v961_v12, %v609_v60  ;;  %v1009_v51 = vrot.slane %v980_v7, 4  ;;  %v975_v22 = vrot.slane %v3241_v50, 4 }
 0x1c2   : > { %v998_v37 = vsel %vm625_vm1, %v997_v24, %v619_v52  ;;  %v968_v56 = vperm.slane %v962_v48, %v2987_v31  ;;  %v844_v15 = vsel %vm625_vm1, %v3199_v63, %v843_v3  ;;  %v999_v11 = vrot.slane %v619_v52, 4 }
 0x1c3   : > { %1107 = vrot.lane.b32.xlu1 %v732_v21, %s2703_s23  ;;  %v1004_v17 = vperm.slane %v998_v37, %v2987_v31  ;;  %v735_v26 = vrot.slane %v3235_v49, 4  ;;  %v987_v61 = vrot.slane %v617_v42, 4  ;;  %v976_v50 = vsel %vm625_vm1, %v3230_v18, %v975_v22 }
 0x1c4   : > { %v1010_v28 = vsel %vm625_vm1, %v1009_v51, %v968_v56  ;;  %v1011_v57 = vrot.slane %v968_v56, 4  ;;  %v1000_v54 = vsel %vm625_vm1, %v623_v41, %v999_v11  ;;  %v963_v49 = vrot.slane %v609_v60, 4  ;;  %v3347_v51 = vld [vmem:[%s2804_s15 + $0x20] sm:$0xff] }
 0x1c5   : > { %1115 = vrot.lane.b32.xlu0 %v734_v55, %s2704_s24  ;;  %v1033_v34 = vrot.slane %v1004_v17, 4  ;;  %v1016_v5 = vperm.slane %v1010_v28, %v3008_v29  ;;  %v736_v21 = vsel %vm625_vm1, %v3218_v38, %v735_v26  ;;  %v984_v38 = vperm.slane %v976_v50, %v2987_v31  ;;  %v3364_v28 = vld [vmem:[%s2804_s15 + $0x28] sm:$0xff] }
 0x1c6   : > { %v964_v52 = vsel %vm625_vm1, %v3256_v58, %v963_v49 }
 0x1c7   : > { %v1059_v16 = vrot.slane %v1016_v5, 4  ;;  %v1021_v24 = vrot.slane %v984_v38, 4  ;;  %v972_v12 = vperm.slane %v964_v52, %v2987_v31 }
 0x1c8   : > { %v577_v27 = vpop.permute.xlu1 %576 }
 0x1c9   : > { %v621_v36 = vsel %vm591_vm0, %v2952_v8, %v577_v27  ;;  %1099 = vrot.lane.b32.xlu2 %v730_v10, %s2702_s22  ;;  %v848_v8 = vsel %vm625_vm1, %v832_v40, %v847_v20  ;;  %v1012_v40 = vsel %vm625_vm1, %v980_v7, %v1011_v57  ;;  %v1022_v7 = vsel %vm625_vm1, %v1021_v24, %v972_v12 }
 0x1ca   : > { %v985_v59 = vrot.slane %v621_v36, 4  ;;  %v988_v32 = vsel %vm625_vm1, %v621_v36, %v987_v61  ;;  %v1020_v41 = vperm.slane %v1012_v40, %v3008_v29  ;;  %v1028_v58 = vperm.slane %v1022_v7, %v3008_v29  ;;  %v3387_v40 = vld [vmem:[%s2804_s15 + $0x38] sm:$0xff] }
 0x1cb   : > { %1117 = vrot.lane.b32.xlu1 %v846_v43, %s2704_s24  ;;  %v996_v19 = vperm.slane %v988_v32, %v2987_v31  ;;  %v1023_v20 = vrot.slane %v972_v12, 4  ;;  %v1283_v61 = vperm.slane %v3347_v51, 3 }
 0x1cc   : > { %v986_v44 = vsel %vm625_vm1, %v985_v59, %v617_v42  ;;  %v1067_v59 = vrot.slane %v1028_v58, 4 }
 0x1cd   : > { %v992_v46 = vperm.slane %v986_v44, %v2987_v31  ;;  %1125 = vrot.lane.b32.xlu0 %v848_v8, %s2705_s25 }
 0x1cf   : > { %v1035_v30 = vrot.slane %v992_v46, 4  ;;  %v1034_v35 = vsel %vm625_vm1, %v1033_v34, %v992_v46  ;;  %v1270_v46 = vperm.slane %v3347_v51, 2  ;;  %v1244_v34 = vperm.slane %v3347_v51, 0 }
 0x1d1   : > { %1109 = vrot.lane.b32.xlu2 %v844_v15, %s2703_s23  ;;  %v1036_v62 = vsel %vm625_vm1, %v1004_v17, %v1035_v30 }
 0x1d2   : > { %v1044_v63 = vperm.slane %v1036_v62, %v3008_v29 }
 0x1d3   : > { %1131 = vrot.lane.b32.xlu1 %v3040_v39, %s2706_s26  ;;  %v1040_v39 = vperm.slane %v1034_v35, %v3008_v29  ;;  %v1400_v35 = vperm.slane %v3364_v28, 4 }
 0x1d4   : > { %v1061_v55 = vrot.slane %v1044_v63, 4 }
 0x1d5   : > { %1139 = vrot.lane.b32.xlu0 %v3033_v33, %s2707_s27  ;;  %v1008_v33 = vperm.slane %v1000_v54, %v2987_v31  ;;  %v1060_v14 = vsel %vm625_vm1, %v1040_v39, %v1059_v16  ;;  %v1057_v13 = vrot.slane %v1040_v39, 4  ;;  %v1309_v16 = vperm.slane %v3347_v51, 5 }
 0x1d6   : > { %v1062_v18 = vsel %vm625_vm1, %v1061_v55, %v1020_v41  ;;  %v1621_v55 = vperm.slane %v3387_v40, 5 }
 0x1d7   : > { %v1045_v53 = vrot.slane %v1008_v33, 4  ;;  %v1058_v10 = vsel %vm625_vm1, %v1057_v13, %v1016_v5  ;;  %v3373_v5 = vld [vmem:[%s2804_s15 + $0x30] sm:$0xff]  ;;  %s2440_s15 = sshll.u32 %s2685_s9, 4  ;;  %s2305_s9 = scalar_lea.sflag [#allocation4], %s2800_s5 }
 0x1d8   : > { %v1530_v54 = vperm.slane %v3373_v5, 6 }
 0x1d9   : > { %1123 = vrot.lane.b32.xlu2 %v736_v21, %s2705_s25  ;;  %v1046_v27 = vsel %vm625_vm1, %v1045_v53, %v996_v19 }
 0x1da   : > { %v1052_v60 = vperm.slane %v1046_v27, %v3008_v29 }
 0x1db   : > { %1141 = vrot.lane.b32.xlu1 %v1060_v14, %s2707_s27  ;;  %v1296_v14 = vperm.slane %v3347_v51, 4 }
 0x1dc   : > { %v1065_v36 = vrot.slane %v1052_v60, 4  ;;  %v1068_v43 = vsel %vm625_vm1, %v1052_v60, %v1067_v59 }
 0x1dd   : > { %1149 = vrot.lane.b32.xlu0 %v1062_v18, %s2708_s28 }
 0x1de   : > { %v1066_v37 = vsel %vm625_vm1, %v1065_v36, %v1028_v58 }
 0x1e1   : > { %1133 = vrot.lane.b32.xlu2 %v1058_v10, %s2706_s26 }
 0x1e3   : > { %1155 = vrot.lane.b32.xlu1 %v3043_v25, %s2709_s29  ;;  %v1063_v25 = vrot.slane %v1020_v41, 4 }
 0x1e5   : > { %1163 = vrot.lane.b32.xlu0 %v3054_v4, %s2710_s30  ;;  %v1047_v4 = vrot.slane %v996_v19, 4  ;;  %v1064_v42 = vsel %vm625_vm1, %v1044_v63, %v1063_v25  ;;  %v1465_v63 = vperm.slane %v3373_v5, 1  ;;  %v1322_v19 = vperm.slane %v3347_v51, 6 }
 0x1e7   : > { %v1048_v48 = vsel %vm625_vm1, %v1008_v33, %v1047_v4 }
 0x1e8   : > { %v1056_v8 = vperm.slane %v1048_v48, %v3008_v29  ;;  %v1361_v48 = vperm.slane %v3364_v28, 1 }
 0x1e9   : > { %1147 = vrot.lane.b32.xlu2 %v3062_v47, %s2708_s28  ;;  %v1024_v47 = vsel %vm625_vm1, %v984_v38, %v1023_v20 }
 0x1ea   : > { %v1032_v44 = vperm.slane %v1024_v47, %v3008_v29  ;;  %v1069_v3 = vrot.slane %v1056_v8, 4 }
 0x1eb   : > { %1165 = vrot.lane.b32.xlu1 %v1066_v37, %s2710_s30 }
 0x1ec   : > { %v1071_v17 = vrot.slane %v1032_v44, 4  ;;  %v1070_v15 = vsel %vm625_vm1, %v1069_v3, %v1032_v44  ;;  %v1426_v3 = vperm.slane %v3364_v28, 6 }
 0x1ed   : > { %1173 = vrot.lane.b32.xlu0 %v1068_v43, %s2711_s2 }
 0x1f1   : > { %1157 = vrot.lane.b32.xlu2 %v1064_v42, %s2709_s29  ;;  %v1348_v42 = vperm.slane %v3364_v28, 0 }
 0x1f3   : > { %1179 = vrot.lane.b32.xlu1 %v3075_v9, %s2712_s3  ;;  %v1072_v9 = vsel %vm625_vm1, %v1056_v8, %v1071_v17 }
 0x1f5   : > { %1187 = vrot.lane.b32.xlu0 %v3065_v6, %s2713_s4  ;;  %v1257_v6 = vperm.slane %v3347_v51, 1 }
 0x1f9   : > { %1171 = vrot.lane.b32.xlu2 %v3047_v0, %s2711_s2  ;;  %v1335_v0 = vperm.slane %v3347_v51, 7 }
 0x1fb   : > { %1189 = vrot.lane.b32.xlu1 %v1072_v9, %s2713_s4 }
 0x1fd   : > { %1275 = vperm.xlu0 %2552, %v1270_v46   ;;  %v1092_v11 = vpop.permute.xlu0 %1091 }
 0x1ff   : > { %v1076_v56 = vpop.permute.xlu1 %1075 }
 0x200   : > { %v1194_v30 = vsel %vm1193_vm2, %v3123_v23, %v1076_v56 }
 0x201   : > { %1181 = vrot.lane.b32.xlu2 %v1070_v15, %s2712_s3 }
 0x203   : > { %1262 = vperm.xlu1 %2553, %v1257_v6  }
 0x205   : > { %1340 = vperm.xlu0 %2552, %v1335_v0  }
 0x207   : > { %v1084_v62 = vpop.permute.xlu1 %1083 }
 0x208   : > { %v1197_v23 = vsel %vm1196_vm3, %v1194_v30, %v1084_v62 }
 0x209   : > { %1249 = vperm.xlu2 %2551, %v1244_v34   ;;  %v1200_v22 = vsel %vm1199_vm4, %v1197_v23, %v1092_v11  ;;  %v1491_v11 = vperm.slane %v3373_v5, 3 }
 0x20b   : > { %2555 = vset.pattern.permute.xlu1 %v2815_v2 }
 0x20d   : > { %1405 = vperm.xlu0 %2552, %v1400_v35  }
 0x211   : > { %2554 = vset.pattern.permute.xlu2 %v2815_v2 }
 0x213   : > { %1281 = vperm.xlu1 %2555, %v1270_v46   ;;  %v1078_v57 = vpop.permute.xlu2 %1077 }
 0x214   : > { %v1195_v26 = vsel %vm1193_vm2, %v3212_v45, %v1078_v57  ;;  %v1595_v45 = vperm.slane %v3387_v40, 3 }
 0x215   : > { %1470 = vperm.xlu0 %2552, %v1465_v63  }
 0x219   : > { %1268 = vperm.xlu2 %2554, %v1257_v6  }
 0x21b   : > { %1294 = vperm.xlu1 %2555, %v1283_v61   ;;  %v1086_v39 = vpop.permute.xlu2 %1085 }
 0x21c   : > { %v1198_v21 = vsel %vm1196_vm3, %v1195_v26, %v1086_v39 }
 0x21d   : > { %1535 = vperm.xlu0 %2552, %v1530_v54  }
 0x221   : > { %2556 = vset.pattern.permute.xlu2 %v2810_v1 }
 0x223   : > { %2557 = vset.pattern.permute.xlu1 %v2810_v1  ;;  %v1100_v50 = vpop.permute.xlu2 %1099 }
 0x224   : > { %v1203_v32 = vsel %vm1202_vm5, %v1200_v22, %v1100_v50  ;;  %v1556_v50 = vperm.slane %v3387_v40, 0 }
 0x225   : > { %1600 = vperm.xlu0 %2552, %v1595_v45  }
 0x229   : > { %1288 = vperm.xlu2 %2556, %v1283_v61   ;;  %v1387_v61 = vperm.slane %v3364_v28, 3 }
 0x22b   : > { %1314 = vperm.xlu1 %2557, %v1309_v16   ;;  %v1110_v33 = vpop.permute.xlu2 %1109 }
 0x22d   : > { %1626 = vperm.xlu0 %2552, %v1621_v55   ;;  %v1094_v49 = vpop.permute.xlu1 %1093 }
 0x22e   : > { %v1201_v41 = vsel %vm1199_vm4, %v1198_v21, %v1094_v49 }
 0x22f   : > { %v1102_v38 = vpop.permute.xlu0 %1101 }
 0x230   : > { %v1204_v18 = vsel %vm1202_vm5, %v1201_v41, %v1102_v38 }
 0x231   : > { %1301 = vperm.xlu2 %2556, %v1296_v14   ;;  %v1207_v13 = vsel %vm1205_vm6, %v1204_v18, %v1110_v33  ;;  %v1439_v18 = vperm.slane %v3364_v28, 7 }
 0x233   : > { %1327 = vperm.xlu1 %2557, %v1322_v19   ;;  %v1124_v53 = vpop.permute.xlu2 %1123 }
 0x235   : > { %2578 = vset.pattern.permute.xlu0 %v2815_v2  ;;  %v1108_v52 = vpop.permute.xlu1 %1107 }
 0x236   : > { %v1206_v24 = vsel %vm1205_vm6, %v1203_v32, %v1108_v52 }
 0x237   : > { %v1116_v27 = vpop.permute.xlu0 %1115 }
 0x238   : > { %v1209_v10 = vsel %vm1208_vm7, %v1206_v24, %v1116_v27 }
 0x239   : > { %2558 = vset.pattern.permute.xlu2 %v2815_v2  ;;  %v1212_v12 = vsel %vm1211_vm8, %v1209_v10, %v1124_v53 }
 0x23b   : > { %2559 = vset.pattern.permute.xlu1 %v2815_v2  ;;  %v1134_v60 = vpop.permute.xlu2 %1133 }
 0x23d   : > { %1255 = vperm.xlu0 %2578, %v1244_v34   ;;  %v1118_v7 = vpop.permute.xlu1 %1117  ;;  %v1374_v34 = vperm.slane %v3364_v28, 2 }
 0x23e   : > { %v1210_v58 = vsel %vm1208_vm7, %v1207_v13, %v1118_v7  ;;  %v1452_v13 = vperm.slane %v3373_v5, 0 }
 0x23f   : > { %v1126_v36 = vpop.permute.xlu0 %1125 }
 0x240   : > { %v1213_v37 = vsel %vm1211_vm8, %v1210_v58, %v1126_v36 }
 0x241   : > { %1320 = vperm.xlu2 %2558, %v1309_v16   ;;  %v1216_v59 = vsel %vm1214_vm9, %v1213_v37, %v1134_v60 }
 0x243   : > { %1346 = vperm.xlu1 %2559, %v1335_v0   ;;  %v1148_v43 = vpop.permute.xlu2 %1147 }
 0x245   : > { %1307 = vperm.xlu0 %2578, %v1296_v14   ;;  %v1132_v25 = vpop.permute.xlu1 %1131 }
 0x246   : > { %v1215_v20 = vsel %vm1214_vm9, %v1212_v12, %v1132_v25 }
 0x247   : > { %v1140_v4 = vpop.permute.xlu0 %1139 }
 0x248   : > { %v1218_v47 = vsel %vm1217_vm10, %v1215_v20, %v1140_v4 }
 0x249   : > { %1333 = vperm.xlu2 %2558, %v1322_v19   ;;  %v1221_v44 = vsel %vm1220_vm11, %v1218_v47, %v1148_v43  ;;  %v1413_v19 = vperm.slane %v3364_v28, 5  ;;  %v1478_v28 = vperm.slane %v3373_v5, 2 }
 0x24b   : > { %1359 = vperm.xlu1 %2559, %v1348_v42   ;;  %v1158_v8 = vpop.permute.xlu2 %1157 }
 0x24d   : > { %1372 = vperm.xlu0 %2578, %v1361_v48   ;;  %v1142_v51 = vpop.permute.xlu1 %1141 }
 0x24e   : > { %v1219_v17 = vsel %vm1217_vm10, %v1216_v59, %v1142_v51  ;;  %v1517_v59 = vperm.slane %v3373_v5, 5  ;;  %v1543_v51 = vperm.slane %v3373_v5, 7 }
 0x24f   : > { %v1150_v46 = vpop.permute.xlu0 %1149 }
 0x250   : > { %v1222_v9 = vsel %vm1220_vm11, %v1219_v17, %v1150_v46 }
 0x251   : > { %2560 = vset.pattern.permute.xlu2 %v2810_v1  ;;  %v1225_v56 = vsel %vm3966_vm12, %v1222_v9, %v1158_v8 }
 0x253   : > { %2561 = vset.pattern.permute.xlu1 %v2810_v1  ;;  %v1172_v30 = vpop.permute.xlu2 %1171 }
 0x255   : > { %1437 = vperm.xlu0 %2578, %v1426_v3   ;;  %v1156_v6 = vpop.permute.xlu1 %1155 }
 0x256   : > { %v1224_v15 = vsel %vm3966_vm12, %v1221_v44, %v1156_v6  ;;  %vm1235_vm12 = vcmask 244736  }
 0x257   : > { %v1164_v0 = vpop.permute.xlu0 %1163 }
 0x258   : > { %v1227_v62 = vsel %vm1226_vm13, %v1224_v15, %v1164_v0 }
 0x259   : > { %1353 = vperm.xlu2 %2560, %v1348_v42   ;;  %v1230_v23 = vsel %vm1229_vm14, %v1227_v62, %v1172_v30  ;;  %v1582_v30 = vperm.slane %v3387_v40, 2 }
 0x25b   : > { %1379 = vperm.xlu1 %2561, %v1374_v34   ;;  %v1182_v39 = vpop.permute.xlu2 %1181 }
 0x25d   : > { %1502 = vperm.xlu0 %2578, %v1491_v11   ;;  %v1166_v22 = vpop.permute.xlu1 %1165 }
 0x25e   : > { %v1228_v57 = vsel %vm1226_vm13, %v1225_v56, %v1166_v22 }
 0x25f   : > { %v1174_v26 = vpop.permute.xlu0 %1173 }
 0x260   : > { %v1231_v21 = vsel %vm1229_vm14, %v1228_v57, %v1174_v26 }
 0x261   : > { %1366 = vperm.xlu2 %2560, %v1361_v48   ;;  %v1234_v32 = vsel %vm1232_vm15, %v1231_v21, %v1182_v39 }
 0x263   : > { %1392 = vperm.xlu1 %2561, %v1387_v61   ;;  %v3456_v53 = vpop.permute.xlu2 %1249 }
 0x265   : > { %1567 = vperm.xlu0 %2578, %v1556_v50   ;;  %v1180_v16 = vpop.permute.xlu1 %1179 }
 0x266   : > { %v1233_v33 = vsel %vm1232_vm15, %v1230_v23, %v1180_v16 }
 0x267   : > { %v1188_v49 = vpop.permute.xlu0 %1187 }
 0x268   : > { %v3442_v14 = vsel %vm1235_vm12, %v1233_v33, %v1188_v49 }
 0x269   : > { %2562 = vset.pattern.permute.xlu2 %v2815_v2 }
 0x26b   : > { %2563 = vset.pattern.permute.xlu1 %v2815_v2 }
 0x26d   : > { %v1190_v41 = vpop.permute.xlu1 %1189 }
 0x26e   : > { %v3447_v38 = vsel %vm1235_vm12, %v1234_v32, %v1190_v41 }
 0x26f   : > { %v3464_v24 = vpop.permute.xlu0 %1275 }
 0x271   : > { %1385 = vperm.xlu2 %2562, %v1374_v34  }
 0x273   : > { %1411 = vperm.xlu1 %2563, %v1400_v35   ;;  %v3460_v35 = vpop.permute.xlu2 %1268 }
 0x275   : > { %v3462_v52 = vpop.permute.xlu1 %1262 }
 0x277   : > { %v3473_v12 = vpop.permute.xlu0 %1340 }
 0x279   : > { %1398 = vperm.xlu2 %2562, %v1387_v61  }
 0x27b   : > { %1424 = vperm.xlu1 %2563, %v1413_v19  }
 0x27f   : > { %v3481_v58 = vpop.permute.xlu0 %1405 }
 0x281   : > { %2564 = vset.pattern.permute.xlu2 %v2810_v1 }
 0x283   : > { %2565 = vset.pattern.permute.xlu1 %v2810_v1  ;;  %v3471_v10 = vpop.permute.xlu2 %1288 }
 0x285   : > { %v3469_v27 = vpop.permute.xlu1 %1281 }
 0x287   : > { %v3489_v43 = vpop.permute.xlu0 %1470 }
 0x289   : > { %1418 = vperm.xlu2 %2564, %v1413_v19  }
 0x28b   : > { %1444 = vperm.xlu1 %2565, %v1439_v18   ;;  %v3478_v7 = vpop.permute.xlu2 %1301 }
 0x28d   : > { %v3476_v60 = vpop.permute.xlu1 %1294 }
 0x28f   : > { %v3498_v4 = vpop.permute.xlu0 %1535 }
 0x291   : > { %1431 = vperm.xlu2 %2564, %v1426_v3   ;;  %v1569_v3 = vperm.slane %v3387_v40, 1 }
 0x293   : > { %1457 = vperm.xlu1 %2565, %v1452_v13  }
 0x297   : > { %v3507_v48 = vpop.permute.xlu0 %1600 }
 0x299   : > { %2566 = vset.pattern.permute.xlu2 %v2815_v2 }
 0x29b   : > { %2567 = vset.pattern.permute.xlu1 %v2815_v2  ;;  %v3486_v37 = vpop.permute.xlu2 %1320 }
 0x29d   : > { %v3484_v36 = vpop.permute.xlu1 %1314 }
 0x29f   : > { %v3514_v17 = vpop.permute.xlu0 %1626 }
 0x2a1   : > { %1450 = vperm.xlu2 %2566, %v1439_v18  }
 0x2a3   : > { %1476 = vperm.xlu1 %2567, %v1465_v63   ;;  %v1504_v63 = vperm.slane %v3373_v5, 4  ;;  %v3495_v20 = vpop.permute.xlu2 %1333  ;;  %v1634_v5 = vperm.slane %v3387_v40, 6 }
 0x2a5   : > { %v3493_v25 = vpop.permute.xlu1 %1327  ;;  %1645 = vperm.xlu0 %2578, %v1634_v5  }
 0x2a9   : > { %1463 = vperm.xlu2 %2566, %v1452_v13  }
 0x2ab   : > { %1489 = vperm.xlu1 %2567, %v1478_v28  }
 0x2b1   : > { %2568 = vset.pattern.permute.xlu2 %v2810_v1 }
 0x2b3   : > { %2569 = vset.pattern.permute.xlu1 %v2810_v1  ;;  %v3503_v47 = vpop.permute.xlu2 %1353 }
 0x2b5   : > { %v3501_v42 = vpop.permute.xlu1 %1346 }
 0x2b9   : > { %1483 = vperm.xlu2 %2568, %v1478_v28  }
 0x2bb   : > { %1509 = vperm.xlu1 %2569, %v1504_v63   ;;  %v3511_v8 = vpop.permute.xlu2 %1366 }
 0x2bd   : > { %v3509_v44 = vpop.permute.xlu1 %1359 }
 0x2c1   : > { %1496 = vperm.xlu2 %2568, %v1491_v11  }
 0x2c3   : > { %1522 = vperm.xlu1 %2569, %v1517_v59  }
 0x2c9   : > { %2570 = vset.pattern.permute.xlu2 %v2815_v2 }
 0x2cb   : > { %2571 = vset.pattern.permute.xlu1 %v2815_v2  ;;  %v3518_v9 = vpop.permute.xlu2 %1385 }
 0x2cd   : > { %v3516_v46 = vpop.permute.xlu1 %1379 }
 0x2d1   : > { %1515 = vperm.xlu2 %2570, %v1504_v63  }
 0x2d3   : > { %1541 = vperm.xlu1 %2571, %v1530_v54   ;;  %v1256_v54 = vpop.permute.xlu0 %1255  ;;  %v3525_v6 = vpop.permute.xlu2 %1398 }
 0x2d5   : > { %v3523_v56 = vpop.permute.xlu1 %1392 }
 0x2d9   : > { %1528 = vperm.xlu2 %2570, %v1517_v59  }
 0x2db   : > { %1554 = vperm.xlu1 %2571, %v1543_v51   ;;  %v3529_v15 = vpop.permute.xlu0 %1307 }
 0x2e1   : > { %2572 = vset.pattern.permute.xlu2 %v2810_v1 }
 0x2e3   : > { %2573 = vset.pattern.permute.xlu1 %v2810_v1  ;;  %v3531_v0 = vpop.permute.xlu2 %1418  ;;  %v3540_v11 = vpop.permute.xlu0 %1372 }
 0x2e5   : > { %v3533_v34 = vpop.permute.xlu1 %1411 }
 0x2e9   : > { %1548 = vperm.xlu2 %2572, %v1543_v51  }
 0x2eb   : > { %1574 = vperm.xlu1 %2573, %v1569_v3   ;;  %v3537_v62 = vpop.permute.xlu2 %1431  ;;  %v3551_v26 = vpop.permute.xlu0 %1437 }
 0x2ed   : > { %v3542_v23 = vpop.permute.xlu1 %1424 }
 0x2f1   : > { %1561 = vperm.xlu2 %2572, %v1556_v50   ;;  %v1647_v50 = vperm.slane %v3387_v40, 7 }
 0x2f3   : > { %1587 = vperm.xlu1 %2573, %v1582_v30   ;;  %v1503_v21 = vpop.permute.xlu0 %1502 }
 0x2f4   : > { %v1667_v16 = vsel %vm591_vm0, %v3476_v60, %v1503_v21 }
 0x2f5   : > { %v1928_v41 = vrot.slane %v1667_v16, 4 }
 0x2f9   : > { %2574 = vset.pattern.permute.xlu2 %v2815_v2 }
 0x2fb   : > { %2575 = vset.pattern.permute.xlu1 %v2815_v2  ;;  %v3545_v22 = vpop.permute.xlu2 %1450 }
 0x2fd   : > { %v3547_v57 = vpop.permute.xlu1 %1444 }
 0x301   : > { %1580 = vperm.xlu2 %2574, %v1569_v3  }
 0x303   : > { %1606 = vperm.xlu1 %2575, %v1595_v45   ;;  %v1464_v61 = vpop.permute.xlu2 %1463 }
 0x304   : > { %v1661_v63 = vsel %vm591_vm0, %v1256_v54, %v1464_v61 }
 0x305   : > { %v1458_v39 = vpop.permute.xlu1 %1457  ;;  %v1918_v3 = vrot.slane %v1661_v63, 4 }
 0x306   : > { %v1660_v32 = vsel %vm591_vm0, %v3456_v53, %v1458_v39 }
 0x307   : > { %v1694_v33 = vrot.slane %v1660_v32, 4 }
 0x309   : > { %1593 = vperm.xlu2 %2574, %v1582_v30  }
 0x30b   : > { %2577 = vset.pattern.permute.xlu1 %v2810_v1 }
 0x311   : > { %2576 = vset.pattern.permute.xlu2 %v2810_v1  ;;  %v1662_v1 = vsel %vm591_vm0, %v3462_v52, %v3489_v43  ;;  %v1608_v43 = vperm.slane %v3387_v40, 4  ;;  %v1672_v40 = vsel %vm591_vm0, %v3493_v25, %v3498_v4 }
 0x312   : > { %v1706_v59 = vrot.slane %v1662_v1, 4 }
 0x313   : > { %1652 = vperm.xlu1 %2577, %v1647_v50   ;;  %v1484_v45 = vpop.permute.xlu2 %1483 }
 0x314   : > { %v1664_v49 = vsel %vm591_vm0, %v3464_v24, %v1484_v45 }
 0x315   : > { %v1695_v19 = vsel %vm625_vm1, %v1664_v49, %v1694_v33  ;;  %v1477_v18 = vpop.permute.xlu1 %1476 }
 0x316   : > { %v1663_v13 = vsel %vm591_vm0, %v3460_v35, %v1477_v18  ;;  %v1703_v24 = vperm.slane %v1695_v19, %v2987_v31 }
 0x317   : > { %v1929_v53 = vsel %vm625_vm1, %v1928_v41, %v1663_v13  ;;  %v1930_v28 = vrot.slane %v1663_v13, 4 }
 0x318   : > { %v1935_v54 = vperm.slane %v1929_v53, %v2987_v31 }
 0x319   : > { %v1931_v60 = vsel %vm625_vm1, %v1667_v16, %v1930_v28  ;;  %1639 = vperm.xlu2 %2576, %v1634_v5   ;;  %v1754_v5 = vrot.slane %v1703_v24, 4 }
 0x31a   : > { %v1939_v30 = vperm.slane %v1931_v60, %v2987_v31  ;;  %v1964_v13 = vrot.slane %v1935_v54, 4 }
 0x31b   : > { %2579 = vset.pattern.permute.xlu1 %v2815_v2  ;;  %v1497_v51 = vpop.permute.xlu2 %1496 }
 0x31c   : > { %v1666_v35 = vsel %vm591_vm0, %v3471_v10, %v1497_v51  ;;  %v1976_v19 = vrot.slane %v1939_v30, 4 }
 0x31d   : > { %v1707_v39 = vsel %vm625_vm1, %v1666_v35, %v1706_v59  ;;  %v1490_v52 = vpop.permute.xlu1 %1489 }
 0x31e   : > { %v1715_v61 = vperm.slane %v1707_v39, %v2987_v31  ;;  %v1665_v21 = vsel %vm591_vm0, %v3469_v27, %v1490_v52 }
 0x31f   : > { %v1916_v16 = vrot.slane %v1665_v21, 4  ;;  %v1919_v33 = vsel %vm625_vm1, %v1665_v21, %v1918_v3 }
 0x320   : > { %v1752_v10 = vrot.slane %v1715_v61, 4  ;;  %v1927_v45 = vperm.slane %v1919_v33, %v2987_v31  ;;  %v1755_v41 = vsel %vm625_vm1, %v1715_v61, %v1754_v5 }
 0x321   : > { %v1917_v18 = vsel %vm625_vm1, %v1916_v16, %v1661_v63  ;;  %1613 = vperm.xlu2 %2576, %v1608_v43   ;;  %v1716_v16 = vrot.slane %v1672_v40, 4  ;;  %v1763_v33 = vperm.slane %v1755_v41, %v3008_v29 }
 0x322   : > { %v1923_v53 = vperm.slane %v1917_v18, %v2987_v31  ;;  %v1978_v28 = vrot.slane %v1927_v45, 4  ;;  %v1753_v60 = vsel %vm625_vm1, %v1752_v10, %v1703_v24  ;;  %v3589_v27 = vsel %vm625_vm1, %v1976_v19, %v1927_v45 }
 0x323   : > { %1658 = vperm.xlu1 %2579, %v1647_v50   ;;  %v1692_v50 = vrot.slane %v1664_v49, 4  ;;  %v1704_v24 = vrot.slane %v1666_v35, 4  ;;  %v1802_v41 = vrot.slane %v1763_v33, 4 }
 0x324   : > { %v1966_v59 = vrot.slane %v1923_v53, 4  ;;  %v1965_v51 = vsel %vm625_vm1, %v1964_v13, %v1923_v53  ;;  %v1979_v3 = vsel %vm625_vm1, %v1939_v30, %v1978_v28 }
 0x325   : > { %v1693_v5 = vsel %vm625_vm1, %v1692_v50, %v1660_v32  ;;  %v1705_v61 = vsel %vm625_vm1, %v1704_v24, %v1662_v1 }
 0x326   : > { %v3594_v39 = vsel %vm625_vm1, %v1935_v54, %v1966_v59  ;;  %v1699_v54 = vperm.slane %v1693_v5, %v2987_v31  ;;  %v1711_v21 = vperm.slane %v1705_v61, %v2987_v31 }
 0x328   : > { %v1740_v35 = vrot.slane %v1711_v21, 4 }
 0x329   : > { %2580 = vset.pattern.permute.xlu2 %v2815_v2 }
 0x32a   : > { %v1741_v19 = vsel %vm625_vm1, %v1740_v35, %v1699_v54 }
 0x32b   : > { %1619 = vperm.xlu1 %2579, %v1608_v43   ;;  %v1516_v63 = vpop.permute.xlu2 %1515  ;;  %v1747_v24 = vperm.slane %v1741_v19, %v3008_v29 }
 0x32c   : > { %v1669_v13 = vsel %vm591_vm0, %v3529_v15, %v1516_v63 }
 0x32d   : > { %v1510_v52 = vpop.permute.xlu1 %1509 }
 0x32e   : > { %v1668_v30 = vsel %vm591_vm0, %v3478_v7, %v1510_v52  ;;  %v1759_v52 = vperm.slane %v1753_v60, %v3008_v29 }
 0x32f   : > { %v1718_v2 = vrot.slane %v1668_v30, 4  ;;  %v1717_v10 = vsel %vm625_vm1, %v1716_v16, %v1668_v30  ;;  %v1942_v30 = vrot.slane %v1669_v13, 4  ;;  %v1987_v16 = vperm.slane %v1979_v3, %v3008_v29 }
 0x330   : > { %v1723_v53 = vperm.slane %v1717_v10, %v2987_v31  ;;  %v1798_v35 = vrot.slane %v1759_v52, 4 }
 0x331   : > { %1632 = vperm.xlu2 %2580, %v1621_v55   ;;  %v1742_v55 = vrot.slane %v1699_v54, 4  ;;  %v1719_v32 = vsel %vm625_vm1, %v1672_v40, %v1718_v2 }
 0x332   : > { %v1727_v45 = vperm.slane %v1719_v32, %v2987_v31  ;;  %v1766_v2 = vrot.slane %v1723_v53, 4 }
 0x333   : > { %v1529_v43 = vpop.permute.xlu2 %1528  ;;  %v1743_v1 = vsel %vm625_vm1, %v1711_v21, %v1742_v55  ;;  %v3633_v21 = vperm.slane %v1965_v51, %v3008_v29 }
 0x334   : > { %v3617_v25 = vperm.slane %v1743_v1, %v3008_v29  ;;  %v1778_v5 = vrot.slane %v1727_v45, 4  ;;  %v1671_v32 = vsel %vm591_vm0, %v3486_v37, %v1529_v43 }
 0x335   : > { %v1523_v49 = vpop.permute.xlu1 %1522  ;;  %v1954_v43 = vrot.slane %v1671_v32, 4 }
 0x336   : > { %v1670_v7 = vsel %vm591_vm0, %v3484_v36, %v1523_v49  ;;  %v1794_v63 = vrot.slane %v3617_v25, 4 }
 0x337   : > { %v1730_v4 = vrot.slane %v1670_v7, 4 }
 0x343   : > { %v1549_v18 = vpop.permute.xlu2 %1548 }
 0x344   : > { %v1674_v36 = vsel %vm591_vm0, %v3473_v12, %v1549_v18 }
 0x345   : > { %v1728_v28 = vrot.slane %v1674_v36, 4  ;;  %v1731_v59 = vsel %vm625_vm1, %v1674_v36, %v1730_v4  ;;  %v1542_v50 = vpop.permute.xlu1 %1541 }
 0x346   : > { %v1739_v61 = vperm.slane %v1731_v59, %v2987_v31  ;;  %v1673_v15 = vsel %vm591_vm0, %v3495_v20, %v1542_v50 }
 0x347   : > { %v1729_v12 = vsel %vm625_vm1, %v1728_v28, %v1670_v7  ;;  %v1940_v54 = vrot.slane %v1673_v15, 4  ;;  %v1943_v49 = vsel %vm625_vm1, %v1673_v15, %v1942_v30  ;;  %v1790_v28 = vrot.slane %v1747_v24, 4 }
 0x348   : > { %v1735_v40 = vperm.slane %v1729_v12, %v2987_v31  ;;  %v1776_v55 = vrot.slane %v1739_v61, 4  ;;  %v1779_v60 = vsel %vm625_vm1, %v1739_v61, %v1778_v5  ;;  %v1951_v36 = vperm.slane %v1943_v49, %v2987_v31 }
 0x349   : > { %v1787_v20 = vperm.slane %v1779_v60, %v3008_v29  ;;  %v1941_v51 = vsel %vm625_vm1, %v1940_v54, %v1669_v13  ;;  %v1975_v54 = vperm.slane %v3594_v39, %v3008_v29  ;;  %v1983_v49 = vperm.slane %v3589_v27, %v3008_v29 }
 0x34a   : > { %v1764_v1 = vrot.slane %v1735_v40, 4  ;;  %v1767_v7 = vsel %vm625_vm1, %v1735_v40, %v1766_v2  ;;  %v1777_v19 = vsel %vm625_vm1, %v1776_v55, %v1727_v45  ;;  %v1947_v13 = vperm.slane %v1941_v51, %v2987_v31 }
 0x34b   : > { %v1775_v10 = vperm.slane %v1767_v7, %v3008_v29  ;;  %v3647_v4 = vsel %vm625_vm1, %v1787_v20, %v1802_v41  ;;  %v1800_v18 = vrot.slane %v1787_v20, 4  ;;  %v1783_v37 = vperm.slane %v1777_v19, %v3008_v29 }
 0x34c   : > { %v1765_v3 = vsel %vm625_vm1, %v1764_v1, %v1723_v53  ;;  %v1990_v55 = vrot.slane %v1947_v13, 4 }
 0x34d   : > { %v1555_v59 = vpop.permute.xlu1 %1554  ;;  %v1771_v50 = vperm.slane %v1765_v3, %v3008_v29  ;;  %v3655_v5 = vsel %vm625_vm1, %v1775_v10, %v1794_v63  ;;  %v3660_v41 = vsel %vm625_vm1, %v1783_v37, %v1798_v35  ;;  %v1796_v61 = vrot.slane %v1783_v37, 4 }
 0x34e   : > { %v1675_v45 = vsel %vm591_vm0, %v3501_v42, %v1555_v59  ;;  %v3663_v53 = vsel %vm625_vm1, %v1800_v18, %v1763_v33  ;;  %v2002_v63 = vrot.slane %v1951_v36, 4  ;;  %v1792_v60 = vrot.slane %v1775_v10, 4 }
 0x34f   : > { %v1952_v15 = vrot.slane %v1675_v45, 4  ;;  %v1955_v30 = vsel %vm625_vm1, %v1675_v45, %v1954_v43  ;;  %v1791_v12 = vsel %vm625_vm1, %v1771_v50, %v1790_v28  ;;  %v3672_v42 = vsel %vm625_vm1, %v1796_v61, %v1759_v52 }
 0x350   : > { %v1963_v2 = vperm.slane %v1955_v30, %v2987_v31  ;;  %2142 = vrot.lane.b32.xlu2 %v1791_v12, %s2700_s17  ;;  %v1788_v40 = vrot.slane %v1771_v50, 4  ;;  %v2026_v52 = vrot.slane %v1987_v16, 4  ;;  %v2018_v18 = vrot.slane %v1975_v54, 4 }
 0x351   : > { %v1953_v33 = vsel %vm625_vm1, %v1952_v15, %v1671_v32  ;;  %v2014_v43 = vrot.slane %v3633_v21, 4  ;;  %v2022_v59 = vrot.slane %v1983_v49, 4 }
 0x352   : > { %v1959_v35 = vperm.slane %v1953_v33, %v2987_v31  ;;  %v2000_v20 = vrot.slane %v1963_v2, 4  ;;  %v2003_v39 = vsel %vm625_vm1, %v1963_v2, %v2002_v63  ;;  %v3680_v1 = vsel %vm625_vm1, %v1788_v40, %v1747_v24 }
 0x353   : > { %v2011_v51 = vperm.slane %v2003_v39, %v3008_v29  ;;  %v1793_v24 = vsel %vm625_vm1, %v1792_v60, %v3617_v25  ;;  %v1562_v25 = vpop.permute.xlu2 %1561 }
 0x354   : > { %v1988_v7 = vrot.slane %v1959_v35, 4  ;;  %v1991_v19 = vsel %vm625_vm1, %v1959_v35, %v1990_v55  ;;  %v2001_v32 = vsel %vm625_vm1, %v2000_v20, %v1951_v36 }
 0x355   : > { %v1999_v10 = vperm.slane %v1991_v19, %v3008_v29  ;;  %v2024_v27 = vrot.slane %v2011_v51, 4  ;;  %v2007_v3 = vperm.slane %v2001_v32, %v3008_v29  ;;  %v3688_v28 = vsel %vm625_vm1, %v2011_v51, %v2026_v52 }
 0x356   : > { %v1989_v37 = vsel %vm625_vm1, %v1988_v7, %v1947_v13 }
 0x357   : > { %v1995_v50 = vperm.slane %v1989_v37, %v3008_v29  ;;  %v3696_v36 = vsel %vm625_vm1, %v1999_v10, %v2018_v18  ;;  %v2016_v45 = vrot.slane %v1999_v10, 4  ;;  %v3699_v61 = vsel %vm625_vm1, %v2024_v27, %v1987_v16 }
 0x358   : > { %2150 = vrot.lane.b32.xlu2 %v1793_v24, %s2701_s18  ;;  %v2020_v15 = vrot.slane %v2007_v3, 4  ;;  %v3703_v30 = vsel %vm625_vm1, %v2007_v3, %v2022_v59 }
 0x359   : > { %v2012_v13 = vrot.slane %v1995_v50, 4  ;;  %v3706_v12 = vsel %vm625_vm1, %v1995_v50, %v2014_v43  ;;  %v3709_v63 = vsel %vm625_vm1, %v2016_v45, %v1975_v54  ;;  %v1676_v54 = vsel %vm591_vm0, %v3503_v47, %v1562_v25 }
 0x35a   : > { %v3712_v2 = vsel %vm625_vm1, %v2020_v15, %v1983_v49  ;;  %v1806_v51 = vrot.slane %v1676_v54, 4  ;;  %v1686_v50 = vsel %vm591_vm0, %v3531_v0, %v3514_v17 }
 0x35b   : > { %v3716_v16 = vsel %vm625_vm1, %v2012_v13, %v3633_v21  ;;  %v3718_v40 = vpop.permute.xlu2 %1580  ;;  %v1682_v21 = vsel %vm591_vm0, %v3523_v56, %v3507_v48 }
 0x35c   : > { %v1816_v19 = vrot.slane %v1682_v21, 4 }
 0x35d   : > { %v1575_v55 = vpop.permute.xlu1 %1574 }
 0x35e   : > { %v1678_v49 = vsel %vm591_vm0, %v3511_v8, %v1575_v55 }
 0x35f   : > { %v1818_v52 = vrot.slane %v1678_v49, 4  ;;  %v1817_v8 = vsel %vm625_vm1, %v1816_v19, %v1678_v49 }
 0x360   : > { %v1823_v37 = vperm.slane %v1817_v8, %v2987_v31 }
 0x362   : > { %v1852_v13 = vrot.slane %v1823_v37, 4 }
 0x363   : > { %v3720_v33 = vpop.permute.xlu2 %1593 }
 0x365   : > { %v1588_v60 = vpop.permute.xlu1 %1587 }
 0x366   : > { %v1680_v20 = vsel %vm591_vm0, %v3516_v46, %v1588_v60  ;;  %v1819_v46 = vsel %vm625_vm1, %v1682_v21, %v1818_v52 }
 0x367   : > { %v1804_v39 = vrot.slane %v1680_v20, 4  ;;  %v1807_v7 = vsel %vm625_vm1, %v1680_v20, %v1806_v51  ;;  %v1827_v24 = vperm.slane %v1819_v46, %v2987_v31 }
 0x368   : > { %v1815_v10 = vperm.slane %v1807_v7, %v2987_v31 }
 0x369   : > { %v1805_v18 = vsel %vm625_vm1, %v1804_v39, %v1676_v54  ;;  %v1864_v15 = vrot.slane %v1827_v24, 4 }
 0x36a   : > { %v1811_v56 = vperm.slane %v1805_v18, %v2987_v31  ;;  %v1866_v43 = vrot.slane %v1815_v10, 4 }
 0x36b   : > { %v1865_v20 = vsel %vm625_vm1, %v1864_v15, %v1815_v10 }
 0x36c   : > { %v1854_v45 = vrot.slane %v1811_v56, 4  ;;  %v1853_v0 = vsel %vm625_vm1, %v1852_v13, %v1811_v56 }
 0x36e   : > { %v1855_v17 = vsel %vm625_vm1, %v1823_v37, %v1854_v45 }
 0x36f   : > { %v1863_v18 = vperm.slane %v1855_v17, %v3008_v29 }
 0x373   : > { %v1640_v35 = vpop.permute.xlu2 %1639 }
 0x374   : > { %v1688_v3 = vsel %vm591_vm0, %v3537_v62, %v1640_v35  ;;  %v1842_v62 = vrot.slane %v1686_v50, 4  ;;  %v1867_v35 = vsel %vm625_vm1, %v1827_v24, %v1866_v43 }
 0x375   : > { %v3738_v27 = vpop.permute.xlu1 %1606  ;;  %v1828_v59 = vrot.slane %v1688_v3, 4  ;;  %v1875_v7 = vperm.slane %v1867_v35, %v3008_v29 }
 0x377   : > { %v1914_v37 = vrot.slane %v1875_v7, 4 }
 0x37b   : > { %v1614_v32 = vpop.permute.xlu2 %1613 }
 0x37c   : > { %v1684_v47 = vsel %vm591_vm0, %v3481_v58, %v1614_v32  ;;  %v1859_v32 = vperm.slane %v1853_v0, %v3008_v29 }
 0x37d   : > { %v1830_v48 = vrot.slane %v1684_v47, 4  ;;  %v1829_v25 = vsel %vm625_vm1, %v1828_v59, %v1684_v47  ;;  %v1906_v59 = vrot.slane %v1863_v18, 4 }
 0x37e   : > { %v1835_v54 = vperm.slane %v1829_v25, %v2987_v31  ;;  %v1902_v15 = vrot.slane %v1859_v32, 4 }
 0x37f   : > { %v1831_v58 = vsel %vm625_vm1, %v1688_v3, %v1830_v48 }
 0x380   : > { %v1839_v55 = vperm.slane %v1831_v58, %v2987_v31  ;;  %v1878_v46 = vrot.slane %v1835_v54, 4 }
 0x382   : > { %v1890_v51 = vrot.slane %v1839_v55, 4 }
 0x385   : > { %v1653_v60 = vpop.permute.xlu1 %1652 }
 0x386   : > { %v1690_v49 = vsel %vm591_vm0, %v3547_v57, %v1653_v60  ;;  %v1871_v57 = vperm.slane %v1865_v20, %v3008_v29 }
 0x387   : > { %v1840_v39 = vrot.slane %v1690_v49, 4  ;;  %v1843_v21 = vsel %vm625_vm1, %v1690_v49, %v1842_v62  ;;  %v1568_v62 = vpop.permute.xlu0 %1567 }
 0x388   : > { %v1851_v52 = vperm.slane %v1843_v21, %v2987_v31  ;;  %v1910_v25 = vrot.slane %v1871_v57, 4 }
 0x389   : > { %v1841_v19 = vsel %vm625_vm1, %v1840_v39, %v1686_v50 }
 0x38a   : > { %v1847_v47 = vperm.slane %v1841_v19, %v2987_v31  ;;  %v1888_v8 = vrot.slane %v1851_v52, 4  ;;  %v1891_v10 = vsel %vm625_vm1, %v1851_v52, %v1890_v51  ;;  %v1683_v52 = vsel %vm591_vm0, %v3525_v6, %v3738_v27 }
 0x38b   : > { %v1899_v48 = vperm.slane %v1891_v10, %v3008_v29 }
 0x38c   : > { %v1876_v56 = vrot.slane %v1847_v47, 4  ;;  %v1879_v3 = vsel %vm625_vm1, %v1847_v47, %v1878_v46  ;;  %v1889_v24 = vsel %vm625_vm1, %v1888_v8, %v1839_v55  ;;  %v1633_v47 = vpop.permute.xlu2 %1632 }
 0x38d   : > { %v1887_v43 = vperm.slane %v1879_v3, %v3008_v29  ;;  %v1912_v58 = vrot.slane %v1899_v48, 4  ;;  %v1895_v50 = vperm.slane %v1889_v24, %v3008_v29  ;;  %v3774_v13 = vsel %vm625_vm1, %v1899_v48, %v1914_v37 }
 0x38e   : > { %v1877_v45 = vsel %vm625_vm1, %v1876_v56, %v1835_v54 }
 0x38f   : > { %v1907_v60 = vsel %vm625_vm1, %v1887_v43, %v1906_v59  ;;  %v1904_v35 = vrot.slane %v1887_v43, 4  ;;  %v1883_v55 = vperm.slane %v1877_v45, %v3008_v29  ;;  %v1913_v20 = vsel %vm625_vm1, %v1912_v58, %v1875_v7  ;;  %v1646_v46 = vpop.permute.xlu0 %1645 }
 0x390   : > { %2160 = vrot.lane.b32.xlu2 %v1907_v60, %s2699_s16  ;;  %v1911_v49 = vsel %vm625_vm1, %v1895_v50, %v1910_v25  ;;  %v1908_v17 = vrot.slane %v1895_v50, 4  ;;  %v1689_v6 = vsel %vm591_vm0, %v3551_v26, %v1646_v46 }
 0x391   : > { %v1905_v54 = vsel %vm625_vm1, %v1904_v35, %v1863_v18  ;;  %v1903_v0 = vsel %vm625_vm1, %v1883_v55, %v1902_v15  ;;  %v1900_v39 = vrot.slane %v1883_v55, 4  ;;  %v2040_v18 = vrot.slane %v1683_v52, 4 }
 0x392   : > { %2152 = vrot.lane.b32.xlu0 %v1905_v54, %s2701_s18  ;;  %2144 = vrot.lane.b32.xlu1 %v1903_v0, %s2700_s17  ;;  %v1909_v21 = vsel %vm625_vm1, %v1908_v17, %v1871_v57  ;;  %v1681_v57 = vsel %vm591_vm0, %v3518_v9, %v3720_v33  ;;  %s2320_s18 = scalar_lea.hbm %s3965_s1, %s2440_s15 }
 0x393   : > { %v3787_v51 = vsel %vm625_vm1, %v1900_v39, %v1859_v32  ;;  %v1679_v32 = vsel %vm591_vm0, %v3540_v11, %v3718_v40  ;;  %v2028_v27 = vrot.slane %v1681_v57, 4  ;;  %v2052_v11 = vrot.slane %v1689_v6, 4 }
 0x394   : > { %v2042_v25 = vrot.slane %v1679_v32, 4 }
 0x395   : > { %v1659_v7 = vpop.permute.xlu1 %1658 }
 0x396   : > { %v1691_v19 = vsel %vm591_vm0, %v3545_v22, %v1659_v7  ;;  %v2041_v22 = vsel %vm625_vm1, %v2040_v18, %v1679_v32  ;;  %v2043_v55 = vsel %vm625_vm1, %v1683_v52, %v2042_v25 }
 0x397   : > { %v2064_v8 = vrot.slane %v1691_v19, 4  ;;  %v2047_v9 = vperm.slane %v2041_v22, %v2987_v31 }
 0x398   : > { %2174 = vrot.lane.b32.xlu2 %v3660_v41, %s2703_s23  ;;  %v1687_v41 = vsel %vm591_vm0, %v3542_v23, %v1633_v47 }
 0x399   : > { %v2065_v40 = vsel %vm625_vm1, %v2064_v8, %v1687_v41  ;;  %v2076_v48 = vrot.slane %v2047_v9, 4  ;;  %v2066_v37 = vrot.slane %v1687_v41, 4 }
 0x39a   : > { %2166 = vrot.lane.b32.xlu0 %v3672_v42, %s2702_s22  ;;  %2158 = vrot.lane.b32.xlu1 %v3655_v5, %s2699_s16  ;;  %v1677_v5 = vsel %vm591_vm0, %v3509_v44, %v1568_v62  ;;  %v2071_v33 = vperm.slane %v2065_v40, %v2987_v31 }
 0x39b   : > { %v2029_v23 = vsel %vm625_vm1, %v2028_v27, %v1677_v5  ;;  %v2067_v45 = vsel %vm625_vm1, %v1691_v19, %v2066_v37  ;;  %v2030_v0 = vrot.slane %v1677_v5, 4 }
 0x39c   : > { %v2100_v3 = vrot.slane %v2071_v33, 4  ;;  %v2075_v35 = vperm.slane %v2067_v45, %v2987_v31 }
 0x39d   : > { %v1620_v10 = vpop.permute.xlu1 %1619  ;;  %v2031_v52 = vsel %vm625_vm1, %v1681_v57, %v2030_v0 }
 0x39e   : > { %v1685_v26 = vsel %vm591_vm0, %v3533_v34, %v1620_v10  ;;  %v2035_v34 = vperm.slane %v2029_v23, %v2987_v31  ;;  %v2039_v47 = vperm.slane %v2031_v52, %v2987_v31  ;;  %vm3971_vm0 = vcmask 179200  }
 0x39f   : > { %v2053_v42 = vsel %vm625_vm1, %v2052_v11, %v1685_v26  ;;  %v2054_v43 = vrot.slane %v1685_v26, 4 }
 0x3a0   : > { %2184 = vrot.lane.b32.xlu2 %v1913_v20, %s2704_s24  ;;  %v2059_v56 = vperm.slane %v2053_v42, %v2987_v31  ;;  %v2077_v24 = vsel %vm625_vm1, %v2076_v48, %v2035_v34  ;;  %v2078_v7 = vrot.slane %v2035_v34, 4 }
 0x3a1   : > { %v2083_v59 = vperm.slane %v2077_v24, %v3008_v29 }
 0x3a2   : > { %2176 = vrot.lane.b32.xlu0 %v1911_v49, %s2703_s23  ;;  %2168 = vrot.lane.b32.xlu1 %v1909_v21, %s2702_s22  ;;  %v2101_v44 = vsel %vm625_vm1, %v2100_v3, %v2059_v56  ;;  %v2051_v49 = vperm.slane %v2043_v55, %v2987_v31  ;;  %v2102_v17 = vrot.slane %v2059_v56, 4  ;;  %s167_s23 = scalar_lea.vmem [#allocation5], %s2427_s13 }
 0x3a3   : > { %v2107_v58 = vperm.slane %v2101_v44, %v3008_v29  ;;  %v2126_v62 = vrot.slane %v2083_v59, 4 }
 0x3a4   : > { %v2088_v19 = vrot.slane %v2051_v49, 4  ;;  %v2103_v18 = vsel %vm625_vm1, %v2071_v33, %v2102_v17 }
 0x3a5   : > { %v2124_v60 = vrot.slane %v2107_v58, 4  ;;  %v2127_v20 = vsel %vm625_vm1, %v2107_v58, %v2126_v62  ;;  %v2111_v8 = vperm.slane %v2103_v18, %v3008_v29 }
 0x3a6   : > { %v2089_v32 = vsel %vm625_vm1, %v2088_v19, %v2039_v47 }
 0x3a7   : > { %v2128_v22 = vrot.slane %v2111_v8, 4 }
 0x3a8   : > { %2198 = vrot.lane.b32.xlu2 %v3716_v16, %s2706_s26  ;;  %v2055_v16 = vsel %vm625_vm1, %v1689_v6, %v2054_v43 }
 0x3aa   : > { %v2143_v50 = vpop.permute.xlu2 %2142  ;;  %2190 = vrot.lane.b32.xlu0 %v3647_v4, %s2705_s25  ;;  %2182 = vrot.lane.b32.xlu1 %v3663_v53, %s2704_s24  ;;  %v2063_v4 = vperm.slane %v2055_v16, %v2987_v31  ;;  %v2125_v53 = vsel %vm625_vm1, %v2124_v60, %v2083_v59  ;;  %v2095_v31 = vperm.slane %v2089_v32, %v3008_v29  ;;  %s2321_s24 = sshll.u32 %s167_s23, 4  ;;  %s2322_s24 = int_to_ptr.vmem [resolvable:$true] %s2321_s24 }
 0x3ab   : > { %v2260_v15 = vsel %vm1193_vm2, %v3680_v1, %v2143_v50  ;;  %v2112_v1 = vrot.slane %v2075_v35, 4 }
 0x3ac   : > { %v2114_v11 = vrot.slane %v2063_v4, 4  ;;  %v2134_v23 = vrot.slane %v2095_v31, 4 }
 0x3ad   : > { %v2113_v21 = vsel %vm625_vm1, %v2112_v1, %v2063_v4 }
 0x3ae   : > { %v2119_v46 = vperm.slane %v2113_v21, %v3008_v29  ;;  %v2115_v10 = vsel %vm625_vm1, %v2075_v35, %v2114_v11 }
 0x3af   : > { %v2123_v26 = vperm.slane %v2115_v10, %v3008_v29 }
 0x3b0   : > { %2208 = vrot.lane.b32.xlu2 %v2127_v20, %s2707_s27  ;;  %v2132_v57 = vrot.slane %v2119_v46, 4  ;;  %v2135_v48 = vsel %vm625_vm1, %v2119_v46, %v2134_v23 }
 0x3b1   : > { %v2136_v5 = vrot.slane %v2123_v26, 4 }
 0x3b2   : > { %v2151_v54 = vpop.permute.xlu2 %2150  ;;  %2192 = vrot.lane.b32.xlu1 %v3774_v13, %s2705_s25  ;;  %2200 = vrot.lane.b32.xlu0 %v2125_v53, %s2706_s26  ;;  %v2079_v13 = vsel %vm625_vm1, %v2047_v9, %v2078_v7  ;;  %s2323_s25 = sshll.u32 %s2320_s18, 4  ;;  %s2324_s25 = int_to_ptr.hbm [resolvable:$true] %s2323_s25 }
 0x3b3   : > { %v3850_v39 = vsel %vm1196_vm3, %v2260_v15, %v2151_v54  ;;  %v2087_v6 = vperm.slane %v2079_v13, %v3008_v29  ;;  %s2625_s26 = sshra.s32 %s2324_s25, 4  ;;  %s2626_s26 = int_to_ptr.hbm [resolvable:$true] %s2625_s26 }
 0x3b4   : > { %p2632_p7 = scmp.lt.s32.totalorder %s2626_s26, %s3965_s1 }
 0x3b5   : > { %v2130_v41 = vrot.slane %v2087_v6, 4  ;;  %v2129_v27 = vsel %vm625_vm1, %v2128_v22, %v2087_v6 }
 0x3b8   : > { %2222 = vrot.lane.b32.xlu2 %v3696_v36, %s2709_s29  ;;  %v2133_v36 = vsel %vm625_vm1, %v2132_v57, %v2095_v31 }
 0x3ba   : > { %2206 = vrot.lane.b32.xlu1 %v3706_v12, %s2707_s27  ;;  %2214 = vrot.lane.b32.xlu0 %v3709_v63, %s2708_s28  ;;  %v2131_v12 = vsel %vm625_vm1, %v2111_v8, %v2130_v41  ;;  %v2090_v63 = vrot.slane %v2039_v47, 4  ;;  %s2627_s27 = scalar_lea.hbm %s2626_s26, 16 }
 0x3bb   : > { %p2628_p4 = scmp.ne.s32.totalorder %s2626_s26, %s2627_s27 }
 0x3bc   : > { %v2091_v40 = vsel %vm625_vm1, %v2051_v49, %v2090_v63 }
 0x3bd   : > { %v2099_v9 = vperm.slane %v2091_v40, %v3008_v29  ;;  %p2629_p5 = pnand %p2628_p4, %p2777_p9 }
 0x3bf   : > { %v2138_v42 = vrot.slane %v2099_v9, 4  ;;  %p2630_p6 = pneg %p2629_p5 }
 0x3c0   : > { %2232 = vrot.lane.b32.xlu2 %v2133_v36, %s2710_s30 }
 0x3c1   : > { %v2139_v33 = vsel %vm625_vm1, %v2123_v26, %v2138_v42 }
 0x3c2   : > { %2216 = vrot.lane.b32.xlu1 %v2129_v27, %s2708_s28  ;;  %2224 = vrot.lane.b32.xlu0 %v2131_v12, %s2709_s29 }
 0x3c8   : > { %2246 = vrot.lane.b32.xlu2 %v3699_v61, %s2712_s3  ;;  %v2137_v61 = vsel %vm625_vm1, %v2136_v5, %v2099_v9  ;;  %vm3972_vm1 = vmmov %vm3971_vm0 }
 0x3ca   : > { %2230 = vrot.lane.b32.xlu1 %v3712_v2, %s2710_s30  ;;  %2238 = vrot.lane.b32.xlu0 %v3703_v30, %s2711_s2  ;;  %s2631_s30 = scalar_lea.hbm %s3965_s1, 32 }
 0x3cb   : > { %p2633_p8 = scmp.lt.s32.totalorder %s2631_s30, %s2627_s27 }
 0x3cd   : > { %p2634_p10 = por %p2633_p8, %p2632_p7 }
 0x3cf   : > { %p2635_p13 = pnand %p2634_p10, %p2630_p6 }
 0x3d0   : > { %2256 = vrot.lane.b32.xlu2 %v2139_v33, %s2713_s4 }
 0x3d2   : > { %2240 = vrot.lane.b32.xlu1 %v2135_v48, %s2711_s2  ;;  %2248 = vrot.lane.b32.xlu0 %v2137_v61, %s2712_s3 }
 0x3da   : > { %2254 = vrot.lane.b32.xlu1 %v3688_v28, %s2713_s4 }
 0x3ea   : > { %v2161_v29 = vpop.permute.xlu2 %2160 }
 0x3f2   : > { %v2175_v30 = vpop.permute.xlu2 %2174 }
 0x3fa   : > { %v2185_v34 = vpop.permute.xlu2 %2184 }
 0x402   : > { %v2199_v44 = vpop.permute.xlu2 %2198 }
 0x404   : > { %v2145_v2 = vpop.permute.xlu1 %2144  ;;  %v2153_v56 = vpop.permute.xlu0 %2152 }
 0x405   : > { %v2261_v16 = vsel %vm1193_vm2, %v3787_v51, %v2145_v2  ;;  %vm2298_vm2 = vcmask 261120  }
 0x406   : > { %v2263_v28 = vsel %vm1196_vm3, %v2261_v16, %v2153_v56  ;;  %vm2301_vm3 = vcmask 523264  }
 0x407   : > { %v2265_v35 = vsel %vm1199_vm4, %v2263_v28, %v2161_v29 }
 0x40a   : > { %v2209_v50 = vpop.permute.xlu2 %2208 }
 0x40c   : > { %v2159_v3 = vpop.permute.xlu1 %2158  ;;  %v2167_v24 = vpop.permute.xlu0 %2166 }
 0x40d   : > { %v2264_v20 = vsel %vm1199_vm4, %v3850_v39, %v2159_v3 }
 0x40e   : > { %v2266_v49 = vsel %vm1202_vm5, %v2264_v20, %v2167_v24 }
 0x40f   : > { %v2268_v54 = vsel %vm1205_vm6, %v2266_v49, %v2175_v30 }
 0x412   : > { %v2223_v25 = vpop.permute.xlu2 %2222 }
 0x414   : > { %v2169_v37 = vpop.permute.xlu1 %2168  ;;  %v2177_v43 = vpop.permute.xlu0 %2176 }
 0x415   : > { %v2267_v55 = vsel %vm1202_vm5, %v2265_v35, %v2169_v37 }
 0x416   : > { %v2269_v53 = vsel %vm1205_vm6, %v2267_v55, %v2177_v43 }
 0x417   : > { %v2271_v51 = vsel %vm1208_vm7, %v2269_v53, %v2185_v34 }
 0x41a   : > { %v2233_v4 = vpop.permute.xlu2 %2232 }
 0x41c   : > { %v2183_v59 = vpop.permute.xlu1 %2182  ;;  %v2191_v58 = vpop.permute.xlu0 %2190 }
 0x41d   : > { %v2270_v21 = vsel %vm1208_vm7, %v2268_v54, %v2183_v59 }
 0x41e   : > { %v2272_v7 = vsel %vm1211_vm8, %v2270_v21, %v2191_v58 }
 0x41f   : > { %v2274_v47 = vsel %vm1214_vm9, %v2272_v7, %v2199_v44 }
 0x422   : > { %v2247_v39 = vpop.permute.xlu2 %2246 }
 0x424   : > { %v2193_v45 = vpop.permute.xlu1 %2192  ;;  %v2201_v15 = vpop.permute.xlu0 %2200 }
 0x425   : > { %v2273_v0 = vsel %vm1211_vm8, %v2271_v51, %v2193_v45 }
 0x426   : > { %v2275_v52 = vsel %vm1214_vm9, %v2273_v0, %v2201_v15 }
 0x427   : > { %v2277_v46 = vsel %vm1217_vm10, %v2275_v52, %v2209_v50 }
 0x42a   : > { %v2257_v27 = vpop.permute.xlu2 %2256 }
 0x42c   : > { %v2207_v62 = vpop.permute.xlu1 %2206  ;;  %v2215_v60 = vpop.permute.xlu0 %2214 }
 0x42d   : > { %v2276_v8 = vsel %vm1217_vm10, %v2274_v47, %v2207_v62 }
 0x42e   : > { %v2278_v57 = vsel %vm1220_vm11, %v2276_v8, %v2215_v60 }
 0x42f   : > { %v2280_v36 = vsel %vm3972_vm1, %v2278_v57, %v2223_v25 }
 0x434   : > { %v2217_v1 = vpop.permute.xlu1 %2216  ;;  %v2225_v17 = vpop.permute.xlu0 %2224 }
 0x435   : > { %v2279_v13 = vsel %vm1220_vm11, %v2277_v46, %v2217_v1 }
 0x436   : > { %v2281_v32 = vsel %vm3971_vm0, %v2279_v13, %v2225_v17 }
 0x437   : > { %v2283_v31 = vsel %vm1226_vm13, %v2281_v32, %v2233_v4 }
 0x43c   : > { %v2231_v19 = vpop.permute.xlu1 %2230  ;;  %v2239_v18 = vpop.permute.xlu0 %2238 }
 0x43d   : > { %v2282_v12 = vsel %vm1226_vm13, %v2280_v36, %v2231_v19 }
 0x43e   : > { %v2284_v40 = vsel %vm1229_vm14, %v2282_v12, %v2239_v18 }
 0x43f   : > { %v2286_v9 = vsel %vm1232_vm15, %v2284_v40, %v2247_v39 }
 0x444   : > { %v2241_v6 = vpop.permute.xlu1 %2240  ;;  %v2249_v22 = vpop.permute.xlu0 %2248 }
 0x445   : > { %v2285_v41 = vsel %vm1229_vm14, %v2283_v31, %v2241_v6 }
 0x446   : > { %v2287_v11 = vsel %vm1232_vm15, %v2285_v41, %v2249_v22 }
 0x447   : > { %v2289_v63 = vsel %vm1235_vm12, %v2287_v11, %v2257_v27 }
 0x448   : > { %2294 = vrot.lane.b32.xlu1 %v2289_v63, %s2714_s12 }
 0x44c   : > { %v2255_v10 = vpop.permute.xlu1 %2254 }
 0x44d   : > { %v2288_v26 = vsel %vm1235_vm12, %v2286_v9, %v2255_v10 }
 0x44e   : > { %2292 = vrot.lane.b32.xlu0 %v2288_v26, %s2714_s12 }
 0x4ba   : > { %v2295_v42 = vpop.permute.xlu1 %2294 }
 0x4bb   : > { %v2300_v5 = vsel %vm2298_vm2, %v3447_v38, %v2295_v42 }
 0x4bc   : > { %2303 = vst.msk [vmem:[%s167_s23 + $0x8] sm:$0xff] %vm2301_vm3, %v2300_v5 }
 0x4c0   : > { %v2293_v33 = vpop.permute.xlu0 %2292 }
 0x4c1   : > { %v2299_v23 = vsel %vm2298_vm2, %v3442_v14, %v2293_v33 }
 0x4c2   : > { %2302 = vst.msk [vmem:[%s167_s23] sm:$0xff] %vm2301_vm3, %v2299_v23 }
 0x4c3   : > { %2638 = shalt.err (!%p2635_p13)
}
 0x4c4   : > { %s2715_s5 = smov 128  }
 0x4c5   : > { %2443 = dma.vmem_to_hbm [thread:$0]  (%p2777_p9), %s2322_s24, 256, %s2324_s25, %s2305_s9, %s2715_s5, %s2715_s5, %s2702_s22  }
 0x4c6 PF: > { %s2338_s4 = sand.u32 1, %s2673_s6   ;;  %p2450_p0 = pnand %p2421_p12, %p2784_p11 }
 0x4c7   : > { %s2339_s12 = scalar_lea.sflag [#allocation4], %s2338_s4 }
 0x4c8   : > { %p2451_p1 = pneg %p2450_p0 }
 0x4ca   : > { %2668 = dma.done.wait (%p2451_p1), %s2339_s12, 256  }
 0x4cb   : > { %2670 = vsyncadd (%p2451_p1), %s2339_s12, 4294967040  ;;  %s17_s11 = sadd.s32 1, %s2693_s11   ;;  %s3973_s6 = smov %s2677_s7 }
 0x4cc   : > { %p14_p2 = scmp.ge.s32.totalorder %s17_s11, 4   ;;  %s3974_s7 = smov %s2681_s8 }
 0x4cd   : > { %s3975_s8 = smov %s2782_s20  ;;  %s3976_s9 = smov %s2689_s10 }
 0x4ce   : > { %s3977_s10 = smov %s3979_s14  ;;  %16 = sbr.rel (!%p14_p2) target bundleno = 6 (0x6), region = 72 }
 0x4d3   :  { %2345 = vsyncpa [#allocation3], 1 }
 0x4d4   :  { %2347 = vsyncpa [#allocation3 + $0x1], 1 }
 0x4d5   :  { %2348 = vsyncpa [#allocation4], 1 }
 0x4d6   :  { %2350 = vsyncpa [#allocation4 + $0x1], 1 }

</bundles_post_ra>
